<compile_context>
chip_gen: v7x
topology: tpu7x:2x2x1
jax: 0.10.0
libtpu: 0.0.40
codegen_flags: <defaults>
</compile_context>

<pallas_src>
import jax
import jax.numpy as jnp
from jax.experimental import pallas as pl
from jax.experimental.pallas import tpu as pltpu

ALPHA = 0.01          # LeakyReLU negative slope
NEG_BIG = -1.0e12     # same mask constant as the PyTorch code


# ----------------------------------------------------------------------------
# Fused GAT + MLP kernel
# ----------------------------------------------------------------------------
def _make_fused_kernel(flatten_mode):
    def kernel(x_ref, w_ref, a1_ref, a2_ref, bias_ref,
               w1_ref, b1_ref, w2_ref, b2_ref, w3_ref, b3_ref, o_ref):
        # x_ref   : (block_k, N_pad, F_in)   bf16
        # w_ref   : (F_in, F_out)            bf16
        # a1_ref  : (F_out, 1) f32           a2_ref : (1, F_out) f32
        # bias_ref: (N_pad, N_pad)           bf16 additive adjacency mask
        # w1_ref  : (N_pad*F_out, H1) bf16   b1_ref : (1, H1) f32   (fc1)
        # w2_ref  : (H1, H2) bf16            b2_ref : (1, H2) f32   (fc2)
        # w3_ref  : (H2, N_out) bf16         b3_ref : (1, N_out) f32 (out)
        # o_ref   : (1, block_k, N_out) f32
        bk, n, f_in = x_ref.shape
        f_out = w_ref.shape[1]

        # ---- GAT: h = X @ W (bf16 MXU inputs, f32 accumulation) ------------
        x2 = x_ref[...].reshape(bk * n, f_in)                    # (bk*N, F_in)
        h2 = jnp.dot(x2, w_ref[...],
                     preferred_element_type=jnp.float32)          # (bk*N, F) f32
        h3 = h2.reshape(bk, n, f_out)                             # (bk, N, F)

        # Edge scores for every node of every fused graph (hoisted: two MXU
        # pushes total, computed in f32 before the exp()).
        src = jnp.dot(h2, a1_ref[...],
                      preferred_element_type=jnp.float32).reshape(bk, n, 1)
        a2_b = jnp.broadcast_to(a2_ref[...][None], (bk, 1, f_out))
        dst = jnp.einsum("bof,bjf->boj", a2_b, h3,
                         preferred_element_type=jnp.float32)      # (bk, 1, N)

        e = src + dst                                             # (bk, N, N)
        e = jnp.where(e > 0.0, e, ALPHA * e)                      # LeakyReLU
        e = e + bias_ref[...].astype(jnp.float32)                 # additive adj mask

        m = jnp.max(e, axis=-1, keepdims=True)
        p = jnp.exp(e - m)
        denom = jnp.sum(p, axis=-1, keepdims=True)
        attn = p * pl.reciprocal(denom, approx=True)              # EUP vrcp

        h3_bf = h3.astype(jnp.bfloat16)                           # hoisted cast
        hp = jnp.einsum("bij,bjf->bif", attn.astype(jnp.bfloat16), h3_bf,
                        preferred_element_type=jnp.float32)       # (bk, N, F)
        hp = jnp.maximum(hp, 0.0)                                 # fused ReLU

        # Flatten node-major (matches torch .view(K, -1)); padded nodes hit
        # zero rows of the padded fc1 weight, so they contribute nothing.
        if flatten_mode == "reshape":
            flat = hp.reshape(bk, n * f_out)                      # (bk, N*F)
        else:
            # Slice/concat-only fallback (no sublane->lane reshape).
            rows = []
            for g in range(bk):
                hp_g = hp[g]                                      # (N, F)
                rows.append(jnp.concatenate(
                    [hp_g[i:i + 1, :] for i in range(n)], axis=1))  # (1, N*F)
            flat = rows[0] if bk == 1 else jnp.concatenate(rows, axis=0)

        # ---- MLP head (bf16 MXU inputs, f32 accumulation) ------------------
        z = jnp.dot(flat.astype(jnp.bfloat16), w1_ref[...],
                    preferred_element_type=jnp.float32) + b1_ref[...]
        z = jnp.maximum(z, 0.0)
        z = jnp.dot(z.astype(jnp.bfloat16), w2_ref[...],
                    preferred_element_type=jnp.float32) + b2_ref[...]
        z = jnp.maximum(z, 0.0)
        q = jnp.dot(z.astype(jnp.bfloat16), w3_ref[...],
                    preferred_element_type=jnp.float32) + b3_ref[...]

        o_ref[0] = q.astype(o_ref.dtype)                          # (bk, N_out)

    return kernel


# ----------------------------------------------------------------------------
# Generation-aware sizing helpers
# ----------------------------------------------------------------------------
def _vmem_capacity_bytes():
    try:
        return int(pltpu.get_tpu_info().vmem_capacity_bytes)
    except Exception:
        return 64 * 1024 * 1024          # conservative (v7x per-TensorCore)


def _num_tensorcores():
    try:
        dev = jax.devices()[0]
        n = getattr(dev, "num_cores", None)
        if isinstance(n, int) and n > 0:
            return max(1, min(n, 2))
        if "v7" in str(getattr(dev, "device_kind", "")).lower():
            return 2
    except Exception:
        pass
    return 1


def _fused_vmem_bytes(block_k, n_pad, f_in, f_out, d1, d2, n_out):
    f32, bf16 = 4, 2
    per_graph = (2 * n_pad * f_in * bf16            # double-buffered X block
                 + 2 * n_out * f32                  # double-buffered out block
                 + n_pad * f_out * (f32 + 2 * bf16)  # h (f32) + bf16 copies
                 + 3 * n_pad * n_pad * f32          # e / p / attn
                 + n_pad * f_out * f32              # h'
                 + n_pad * f_out * bf16             # flattened activations
                 + (d1 + d2) * f32)                 # MLP activations
    weights = (f_in * f_out * bf16 + 2 * f_out * f32 + n_pad * n_pad * bf16
               + n_pad * f_out * d1 * bf16 + d1 * f32
               + d1 * d2 * bf16 + d2 * f32
               + d2 * n_out * bf16 + n_out * f32)
    return block_k * per_graph + 2 * weights


def _max_block_k(K, n_pad, f_in, f_out, d1, d2, n_out, vmem_cap):
    budget = min(vmem_cap // 2, 48 * 1024 * 1024)
    base = _fused_vmem_bytes(0, n_pad, f_in, f_out, d1, d2, n_out)
    per = _fused_vmem_bytes(1, n_pad, f_in, f_out, d1, d2, n_out) - base
    return int(max(1, min(K, (budget - base) // max(per, 1))))


def _choose_block_k(K, num_cores, max_bk):
    max_bk = max(1, min(int(max_bk), K))
    if num_cores > 1 and K >= num_cores:
        # Keep the grid step count a multiple of the core count (v7x: 2 TCs).
        for bk in range(max_bk, 0, -1):
            steps = -(-K // bk)
            if steps % num_cores == 0:
                return bk
        return 1
    # Single TensorCore (v5e/v6e): fewest, fattest steps (grid=1 is fine).
    return max_bk


# ----------------------------------------------------------------------------
# Wrapper: full lataGAT forward as one pallas_call
# ----------------------------------------------------------------------------
def lata_gat_forward(X_flat, adj, params, *, block_k=None):
    """X_flat: [K, N*F_in], adj: [N, N] -> q_value [K, N]."""
    K = X_flat.shape[0]
    n = int(params["n_nodes"])
    f_in = int(params["dim_input"])
    W, a = params["W"], params["a"]
    f_out = W.shape[1]
    d1 = params["w1"].shape[1]
    d2 = params["w2"].shape[1]
    n_out = params["w3"].shape[1]

    # --- layout prep (pure JAX, cheap) -------------------------------------
    n_pad = ((n + 7) // 8) * 8                       # sublane-aligned node count
    X = X_flat.reshape(K, n, f_in)
    if n_pad != n:
        X = jnp.pad(X, ((0, 0), (0, n_pad - n), (0, 0)))

    adj_f = adj.astype(jnp.float32)
    adj_p = jnp.zeros((n_pad, n_pad), jnp.float32).at[:n, :n].set(adj_f)
    if n_pad != n:
        # padded nodes only attend to themselves (keeps their softmax benign)
        adj_p = adj_p + jnp.diag((jnp.arange(n_pad) >= n).astype(jnp.float32))
    bias = jnp.where(adj_p > 0, 0.0, NEG_BIG).astype(jnp.bfloat16)

    # fc1 weight laid out node-major, with zero rows for padded nodes.
    w1 = params["w1"].reshape(n, f_out, d1)
    if n_pad != n:
        w1 = jnp.pad(w1, ((0, n_pad - n), (0, 0), (0, 0)))
    w1 = w1.reshape(n_pad * f_out, d1)

    # --- generation-aware block size / VMEM limit --------------------------
    vmem_cap = _vmem_capacity_bytes()
    num_cores = _num_tensorcores()
    max_bk = _max_block_k(K, n_pad, f_in, f_out, d1, d2, n_out, vmem_cap)
    if block_k is None:
        block_k = _choose_block_k(K, num_cores, max_bk)
    block_k = max(1, min(int(block_k), K))

    steps = -(-K // block_k)
    k_pad = steps * block_k
    if k_pad != K:                                   # pad batch; no divisibility assert
        X = jnp.pad(X, ((0, k_pad - K), (0, 0), (0, 0)))

    est = _fused_vmem_bytes(block_k, n_pad, f_in, f_out, d1, d2, n_out)
    vmem_limit = None
    if est > 8 * 1024 * 1024:                        # v5e default scoped VMEM is 16 MiB
        vmem_limit = int(min(max(2 * est, 32 * 1024 * 1024), vmem_cap * 3 // 4))

    # --- operand dtypes: bf16 for MXU inputs, f32 for biases / a-vectors ----
    X_bf = X.astype(jnp.bfloat16)
    W_bf = W.astype(jnp.bfloat16)
    a1 = a[:f_out, :].astype(jnp.float32)            # (F_out, 1)
    a2 = a[f_out:, :].reshape(1, f_out).astype(jnp.float32)
    w1_bf = w1.astype(jnp.bfloat16)
    w2_bf = params["w2"].astype(jnp.bfloat16)
    w3_bf = params["w3"].astype(jnp.bfloat16)
    b1 = params["b1"].reshape(1, d1).astype(jnp.float32)
    b2 = params["b2"].reshape(1, d2).astype(jnp.float32)
    b3 = params["b3"].reshape(1, n_out).astype(jnp.float32)

    def run(flatten_mode):
        return pl.pallas_call(
            _make_fused_kernel(flatten_mode),
            out_shape=jax.ShapeDtypeStruct((steps, block_k, n_out), jnp.float32),
            grid_spec=pltpu.PrefetchScalarGridSpec(
                num_scalar_prefetch=0,
                grid=(steps,),
                in_specs=[
                    pl.BlockSpec((block_k, n_pad, f_in), lambda k: (k, 0, 0)),
                    pl.BlockSpec((f_in, f_out), lambda k: (0, 0)),
                    pl.BlockSpec((f_out, 1), lambda k: (0, 0)),
                    pl.BlockSpec((1, f_out), lambda k: (0, 0)),
                    pl.BlockSpec((n_pad, n_pad), lambda k: (0, 0)),
                    pl.BlockSpec((n_pad * f_out, d1), lambda k: (0, 0)),
                    pl.BlockSpec((1, d1), lambda k: (0, 0)),
                    pl.BlockSpec((d1, d2), lambda k: (0, 0)),
                    pl.BlockSpec((1, d2), lambda k: (0, 0)),
                    pl.BlockSpec((d2, n_out), lambda k: (0, 0)),
                    pl.BlockSpec((1, n_out), lambda k: (0, 0)),
                ],
                out_specs=pl.BlockSpec((1, block_k, n_out), lambda k: (k, 0, 0)),
            ),
            compiler_params=pltpu.CompilerParams(
                dimension_semantics=("parallel",),
                vmem_limit_bytes=vmem_limit),
        )(X_bf, W_bf, a1, a2, bias, w1_bf, b1, w2_bf, b2, w3_bf, b3)

    try:
        out = run("reshape")
    except Exception:
        # Fallback flatten built only from slice/concat ops, same math.
        out = run("concat")

    return out.reshape(k_pad, n_out)[:K]


# ----------------------------------------------------------------------------
# Pure-JAX references
# ----------------------------------------------------------------------------
def gat_reference(X, W, a, adj):
    h = jnp.einsum("knf,fo->kno", X, W)
    F_out = W.shape[1]
    a1 = a[:F_out, 0]
    a2 = a[F_out:, 0]
    e = h @ a1[:, None] + jnp.swapaxes(h @ a2[:, None], 1, 2)     # (K, N, N)
    e = jnp.where(e > 0, e, ALPHA * e)
    masked = jnp.where(adj[None] > 0, e, NEG_BIG)
    attn = jax.nn.softmax(masked, axis=2)
    return jnp.einsum("kij,kjf->kif", attn, h)


def lata_gat_reference(X_flat, adj, params):
    K = X_flat.shape[0]
    n = params["n_nodes"]
    f_in = params["dim_input"]
    X = X_flat.reshape(K, n, f_in)
    g = jnp.maximum(gat_reference(X, params["W"], params["a"], adj), 0.0)
    x = g.reshape(K, -1)
    x = jnp.maximum(x @ params["w1"] + params["b1"], 0.0)
    x = jnp.maximum(x @ params["w2"] + params["b2"], 0.0)
    return x @ params["w3"] + params["b3"]


def xavier_uniform(key, shape, gain):
    fan_in, fan_out = shape[0], shape[1]
    bound = gain * jnp.sqrt(6.0 / (fan_in + fan_out))
    return jax.random.uniform(key, shape, jnp.float32, -bound, bound)


def linear_init(key, fan_in, fan_out):
    kw, kb = jax.random.split(key)
    bound = 1.0 / jnp.sqrt(fan_in)
    w = jax.random.uniform(kw, (fan_in, fan_out), jnp.float32, -bound, bound)
    b = jax.random.uniform(kb, (1, fan_out), jnp.float32, -bound, bound)
    return w, b


if __name__ == "__main__":
    key = jax.random.PRNGKey(0)
    keys = jax.random.split(key, 16)

    def build(ks, K, N, F_in, F_out):
        gain = 1.414
        W = xavier_uniform(ks[0], (F_in, F_out), gain)
        a = xavier_uniform(ks[1], (2 * F_out, 1), gain)
        w1, b1 = linear_init(ks[2], N * F_out, 256)
        w2, b2 = linear_init(ks[3], 256, 128)
        w3, b3 = linear_init(ks[4], 128, N)
        X_flat = jax.random.normal(ks[5], (K, N * F_in), jnp.float32)
        adj = (jax.random.uniform(ks[6], (N, N)) > 0.4).astype(jnp.float32)
        adj = jnp.clip(adj + jnp.eye(N, dtype=jnp.float32), 0.0, 1.0)  # self loops
        params = dict(W=W, a=a, w1=w1, b1=b1, w2=w2, b2=b2, w3=w3, b3=b3,
                      n_nodes=N, dim_input=F_in)
        return X_flat, adj, params

    # 1) Module defaults: number_of_node=8, dim_input=4, dim_output=32, K=2.
    X_flat, adj, params = build(keys[:7], K=2, N=8, F_in=4, F_out=32)
    q_ref = lata_gat_reference(X_flat, adj, params)

    q = jax.block_until_ready(lata_gat_forward(X_flat, adj, params))
    assert q.shape == (2, 8)
    rel = float(jnp.linalg.norm(q - q_ref) / jnp.linalg.norm(q_ref))
    assert rel < 5e-2, f"lataGAT mismatch (auto block_k): rel={rel}"

    # 2) Forced block_k=1 (multi-step grid path).
    q1 = jax.block_until_ready(lata_gat_forward(X_flat, adj, params, block_k=1))
    rel1 = float(jnp.linalg.norm(q1 - q_ref) / jnp.linalg.norm(q_ref))
    assert rel1 < 5e-2, f"lataGAT mismatch (block_k=1): rel={rel1}"

    # 3) Non-multiple-of-8 node count + batch padding (K=3 with block_k=2).
    X3, adj3, params3 = build(keys[7:14], K=3, N=5, F_in=3, F_out=16)
    q3 = jax.block_until_ready(lata_gat_forward(X3, adj3, params3, block_k=2))
    q3_ref = lata_gat_reference(X3, adj3, params3)
    assert q3.shape == (3, 5)
    rel3 = float(jnp.linalg.norm(q3 - q3_ref) / jnp.linalg.norm(q3_ref))
    assert rel3 < 5e-2, f"lataGAT mismatch (padded N/K): rel={rel3}"

    print("KERNEL_OK")
</pallas_src>

<mosaic_0001>
module attributes {stable_mosaic.version = 11 : i64} {
  func.func @kernel(%arg0: i32, %arg1: memref<2x8x4xbf16, #tpu.memory_space<vmem>>, %arg2: memref<4x32xbf16, #tpu.memory_space<vmem>>, %arg3: memref<32x1xf32, #tpu.memory_space<vmem>>, %arg4: memref<1x32xf32, #tpu.memory_space<vmem>>, %arg5: memref<8x8xbf16, #tpu.memory_space<vmem>>, %arg6: memref<256x256xbf16, #tpu.memory_space<vmem>>, %arg7: memref<1x256xf32, #tpu.memory_space<vmem>>, %arg8: memref<256x128xbf16, #tpu.memory_space<vmem>>, %arg9: memref<1x128xf32, #tpu.memory_space<vmem>>, %arg10: memref<128x8xbf16, #tpu.memory_space<vmem>>, %arg11: memref<1x8xf32, #tpu.memory_space<vmem>>, %arg12: memref<1x2x8xf32, #tpu.memory_space<vmem>>) attributes {dimension_semantics = [#tpu.dimension_semantics<parallel>], iteration_bounds = array<i64: 1>, scalar_prefetch = 0 : i64, scratch_operands = 0 : i64, tpu.core_type = #tpu.core_type<tc>, window_params = [{transform_indices = @transform_0, window_bounds = array<i64: 2, 8, 4>}, {pipeline_mode = #tpu.pipeline_mode<synchronous>, transform_indices = @transform_1, window_bounds = array<i64: 4, 32>}, {pipeline_mode = #tpu.pipeline_mode<synchronous>, transform_indices = @transform_2, window_bounds = array<i64: 32, 1>}, {pipeline_mode = #tpu.pipeline_mode<synchronous>, transform_indices = @transform_3, window_bounds = array<i64: 1, 32>}, {pipeline_mode = #tpu.pipeline_mode<synchronous>, transform_indices = @transform_4, window_bounds = array<i64: 8, 8>}, {pipeline_mode = #tpu.pipeline_mode<synchronous>, transform_indices = @transform_5, window_bounds = array<i64: 256, 256>}, {pipeline_mode = #tpu.pipeline_mode<synchronous>, transform_indices = @transform_6, window_bounds = array<i64: 1, 256>}, {pipeline_mode = #tpu.pipeline_mode<synchronous>, transform_indices = @transform_7, window_bounds = array<i64: 256, 128>}, {pipeline_mode = #tpu.pipeline_mode<synchronous>, transform_indices = @transform_8, window_bounds = array<i64: 1, 128>}, {pipeline_mode = #tpu.pipeline_mode<synchronous>, transform_indices = @transform_9, window_bounds = array<i64: 128, 8>}, {pipeline_mode = #tpu.pipeline_mode<synchronous>, transform_indices = @transform_10, window_bounds = array<i64: 1, 8>}, {transform_indices = @transform_11, window_bounds = array<i64: 1, 2, 8>}]} {
    %c0 = arith.constant 0 : index
    %c0_0 = arith.constant 0 : index
    %c0_1 = arith.constant 0 : index
    %0 = vector.load %arg1[%c0, %c0_0, %c0_1] : memref<2x8x4xbf16, #tpu.memory_space<vmem>>, vector<2x8x4xbf16>
    %1 = vector.shape_cast %0 : vector<2x8x4xbf16> to vector<16x4xbf16>
    %c0_2 = arith.constant 0 : index
    %c0_3 = arith.constant 0 : index
    %2 = vector.load %arg2[%c0_2, %c0_3] : memref<4x32xbf16, #tpu.memory_space<vmem>>, vector<4x32xbf16>
    %cst = arith.constant dense<0.000000e+00> : vector<16x32xf32>
    %3 = tpu.matmul %1, %2, %cst {dimension_numbers = #tpu.dot_dimension_numbers<[1], [0], [0], [1], [0, 0, 1, 1], [], []>} : vector<16x4xbf16>, vector<4x32xbf16>, vector<16x32xf32> -> vector<16x32xf32>
    %4 = vector.shape_cast %3 : vector<16x32xf32> to vector<2x8x32xf32>
    %c0_4 = arith.constant 0 : index
    %c0_5 = arith.constant 0 : index
    %5 = vector.load %arg3[%c0_4, %c0_5] : memref<32x1xf32, #tpu.memory_space<vmem>>, vector<32x1xf32>
    %cst_6 = arith.constant dense<0.000000e+00> : vector<16x1xf32>
    %6 = tpu.matmul %3, %5, %cst_6 {dimension_numbers = #tpu.dot_dimension_numbers<[1], [0], [0], [1], [0, 0, 1, 1], [], []>} : vector<16x32xf32>, vector<32x1xf32>, vector<16x1xf32> -> vector<16x1xf32>
    %7 = vector.shape_cast %6 : vector<16x1xf32> to vector<2x8x1xf32>
    %c0_7 = arith.constant 0 : index
    %c0_8 = arith.constant 0 : index
    %8 = vector.load %arg4[%c0_7, %c0_8] : memref<1x32xf32, #tpu.memory_space<vmem>>, vector<1x32xf32>
    %9 = vector.shape_cast %8 : vector<1x32xf32> to vector<1x1x32xf32>
    %10 = vector.shape_cast %9 : vector<1x1x32xf32> to vector<1x1x32xf32>
    %11 = vector.broadcast %10 : vector<1x1x32xf32> to vector<2x1x32xf32>
    "tpu.trace_start"() <{level = 10 : i32, message = "bof,bjf->boj"}> : () -> ()
    %cst_9 = arith.constant dense<0.000000e+00> : vector<2x1x8xf32>
    %12 = tpu.matmul %11, %4, %cst_9 {dimension_numbers = #tpu.dot_dimension_numbers<[2], [2], [1], [1], [0, 0, 0, 1, 1, 1], [0], [0]>} : vector<2x1x32xf32>, vector<2x8x32xf32>, vector<2x1x8xf32> -> vector<2x1x8xf32>
    "tpu.trace_stop"() : () -> ()
    %13 = vector.broadcast %7 : vector<2x8x1xf32> to vector<2x8x8xf32>
    %14 = vector.broadcast %12 : vector<2x1x8xf32> to vector<2x8x8xf32>
    %15 = arith.addf %13, %14 : vector<2x8x8xf32>
    %cst_10 = arith.constant 0.000000e+00 : f32
    %16 = vector.broadcast %cst_10 : f32 to vector<2x8x8xf32>
    %17 = arith.cmpf ogt, %15, %16 : vector<2x8x8xf32>
    %cst_11 = arith.constant 0.00999999977 : f32
    %18 = vector.broadcast %cst_11 : f32 to vector<2x8x8xf32>
    %19 = arith.mulf %18, %15 : vector<2x8x8xf32>
    %20 = arith.select %17, %15, %19 : vector<2x8x8xi1>, vector<2x8x8xf32>
    %c0_12 = arith.constant 0 : index
    %c0_13 = arith.constant 0 : index
    %21 = vector.load %arg5[%c0_12, %c0_13] : memref<8x8xbf16, #tpu.memory_space<vmem>>, vector<8x8xbf16>
    %22 = arith.extf %21 : vector<8x8xbf16> to vector<8x8xf32>
    %23 = vector.shape_cast %22 : vector<8x8xf32> to vector<1x8x8xf32>
    %24 = vector.broadcast %23 : vector<1x8x8xf32> to vector<2x8x8xf32>
    %25 = arith.addf %20, %24 : vector<2x8x8xf32>
    %cst_14 = arith.constant dense<0xFF800000> : vector<2x8xf32>
    %26 = vector.multi_reduction <maximumf>, %25, %cst_14 [2] : vector<2x8x8xf32> to vector<2x8xf32>
    %27 = vector.shape_cast %26 : vector<2x8xf32> to vector<2x8x1xf32>
    %28 = vector.broadcast %27 : vector<2x8x1xf32> to vector<2x8x8xf32>
    %29 = arith.subf %25, %28 : vector<2x8x8xf32>
    %30 = math.exp %29 : vector<2x8x8xf32>
    %cst_15 = arith.constant dense<0.000000e+00> : vector<2x8xf32>
    %31 = vector.multi_reduction <add>, %30, %cst_15 [2] : vector<2x8x8xf32> to vector<2x8xf32>
    %32 = vector.shape_cast %31 : vector<2x8xf32> to vector<2x8x1xf32>
    %33 = tpu.reciprocal %32 {approx = true} : vector<2x8x1xf32> -> vector<2x8x1xf32>
    %34 = vector.broadcast %33 : vector<2x8x1xf32> to vector<2x8x8xf32>
    %35 = arith.mulf %30, %34 : vector<2x8x8xf32>
    %36 = arith.truncf %4 : vector<2x8x32xf32> to vector<2x8x32xbf16>
    %37 = arith.truncf %35 : vector<2x8x8xf32> to vector<2x8x8xbf16>
    "tpu.trace_start"() <{level = 10 : i32, message = "bij,bjf->bif"}> : () -> ()
    %cst_16 = arith.constant dense<0.000000e+00> : vector<2x8x32xf32>
    %38 = tpu.matmul %37, %36, %cst_16 {dimension_numbers = #tpu.dot_dimension_numbers<[2], [1], [1], [2], [0, 0, 0, 1, 1, 2], [0], [0]>} : vector<2x8x8xbf16>, vector<2x8x32xbf16>, vector<2x8x32xf32> -> vector<2x8x32xf32>
    "tpu.trace_stop"() : () -> ()
    %cst_17 = arith.constant 0.000000e+00 : f32
    %39 = vector.broadcast %cst_17 : f32 to vector<2x8x32xf32>
    %40 = arith.maximumf %38, %39 : vector<2x8x32xf32>
    %41 = vector.shape_cast %40 : vector<2x8x32xf32> to vector<2x256xf32>
    %42 = arith.truncf %41 : vector<2x256xf32> to vector<2x256xbf16>
    %c0_18 = arith.constant 0 : index
    %c0_19 = arith.constant 0 : index
    %43 = vector.load %arg6[%c0_18, %c0_19] : memref<256x256xbf16, #tpu.memory_space<vmem>>, vector<256x256xbf16>
    %cst_20 = arith.constant dense<0.000000e+00> : vector<2x256xf32>
    %44 = tpu.matmul %42, %43, %cst_20 {dimension_numbers = #tpu.dot_dimension_numbers<[1], [0], [0], [1], [0, 0, 1, 1], [], []>} : vector<2x256xbf16>, vector<256x256xbf16>, vector<2x256xf32> -> vector<2x256xf32>
    %c0_21 = arith.constant 0 : index
    %c0_22 = arith.constant 0 : index
    %45 = vector.load %arg7[%c0_21, %c0_22] : memref<1x256xf32, #tpu.memory_space<vmem>>, vector<1x256xf32>
    %46 = vector.broadcast %45 : vector<1x256xf32> to vector<2x256xf32>
    %47 = arith.addf %44, %46 : vector<2x256xf32>
    %cst_23 = arith.constant 0.000000e+00 : f32
    %48 = vector.broadcast %cst_23 : f32 to vector<2x256xf32>
    %49 = arith.maximumf %47, %48 : vector<2x256xf32>
    %50 = arith.truncf %49 : vector<2x256xf32> to vector<2x256xbf16>
    %c0_24 = arith.constant 0 : index
    %c0_25 = arith.constant 0 : index
    %51 = vector.load %arg8[%c0_24, %c0_25] : memref<256x128xbf16, #tpu.memory_space<vmem>>, vector<256x128xbf16>
    %cst_26 = arith.constant dense<0.000000e+00> : vector<2x128xf32>
    %52 = tpu.matmul %50, %51, %cst_26 {dimension_numbers = #tpu.dot_dimension_numbers<[1], [0], [0], [1], [0, 0, 1, 1], [], []>} : vector<2x256xbf16>, vector<256x128xbf16>, vector<2x128xf32> -> vector<2x128xf32>
    %c0_27 = arith.constant 0 : index
    %c0_28 = arith.constant 0 : index
    %53 = vector.load %arg9[%c0_27, %c0_28] : memref<1x128xf32, #tpu.memory_space<vmem>>, vector<1x128xf32>
    %54 = vector.broadcast %53 : vector<1x128xf32> to vector<2x128xf32>
    %55 = arith.addf %52, %54 : vector<2x128xf32>
    %cst_29 = arith.constant 0.000000e+00 : f32
    %56 = vector.broadcast %cst_29 : f32 to vector<2x128xf32>
    %57 = arith.maximumf %55, %56 : vector<2x128xf32>
    %58 = arith.truncf %57 : vector<2x128xf32> to vector<2x128xbf16>
    %c0_30 = arith.constant 0 : index
    %c0_31 = arith.constant 0 : index
    %59 = vector.load %arg10[%c0_30, %c0_31] : memref<128x8xbf16, #tpu.memory_space<vmem>>, vector<128x8xbf16>
    %cst_32 = arith.constant dense<0.000000e+00> : vector<2x8xf32>
    %60 = tpu.matmul %58, %59, %cst_32 {dimension_numbers = #tpu.dot_dimension_numbers<[1], [0], [0], [1], [0, 0, 1, 1], [], []>} : vector<2x128xbf16>, vector<128x8xbf16>, vector<2x8xf32> -> vector<2x8xf32>
    %c0_33 = arith.constant 0 : index
    %c0_34 = arith.constant 0 : index
    %61 = vector.load %arg11[%c0_33, %c0_34] : memref<1x8xf32, #tpu.memory_space<vmem>>, vector<1x8xf32>
    %62 = vector.broadcast %61 : vector<1x8xf32> to vector<2x8xf32>
    %63 = arith.addf %60, %62 : vector<2x8xf32>
    %c0_35 = arith.constant 0 : index
    %c0_36 = arith.constant 0 : index
    %c0_37 = arith.constant 0 : index
    %64 = vector.load %arg12[%c0_35, %c0_36, %c0_37] : memref<1x2x8xf32, #tpu.memory_space<vmem>>, vector<1x2x8xf32>
    %65 = vector.shape_cast %64 : vector<1x2x8xf32> to vector<2x8xf32>
    %66 = vector.shape_cast %63 : vector<2x8xf32> to vector<1x2x8xf32>
    tpu.vector_store %arg12[%c0_35, %c0_36, %c0_37], %66 {strides = array<i32>} : memref<1x2x8xf32, #tpu.memory_space<vmem>>, vector<1x2x8xf32>,
    return
  }
  func.func @transform_0(%arg0: i32) -> (i32, i32, i32) {
    %c0_i32 = arith.constant 0 : i32
    %c0_i32_0 = arith.constant 0 : i32
    %c0_i32_1 = arith.constant 0 : i32
    return %arg0, %c0_i32, %c0_i32_0 : i32, i32, i32
  }
  func.func @transform_1(%arg0: i32) -> (i32, i32) {
    %c0_i32 = arith.constant 0 : i32
    %c0_i32_0 = arith.constant 0 : i32
    %c0_i32_1 = arith.constant 0 : i32
    return %c0_i32, %c0_i32_0 : i32, i32
  }
  func.func @transform_2(%arg0: i32) -> (i32, i32) {
    %c0_i32 = arith.constant 0 : i32
    %c0_i32_0 = arith.constant 0 : i32
    %c0_i32_1 = arith.constant 0 : i32
    return %c0_i32, %c0_i32_0 : i32, i32
  }
  func.func @transform_3(%arg0: i32) -> (i32, i32) {
    %c0_i32 = arith.constant 0 : i32
    %c0_i32_0 = arith.constant 0 : i32
    %c0_i32_1 = arith.constant 0 : i32
    return %c0_i32, %c0_i32_0 : i32, i32
  }
  func.func @transform_4(%arg0: i32) -> (i32, i32) {
    %c0_i32 = arith.constant 0 : i32
    %c0_i32_0 = arith.constant 0 : i32
    %c0_i32_1 = arith.constant 0 : i32
    return %c0_i32, %c0_i32_0 : i32, i32
  }
  func.func @transform_5(%arg0: i32) -> (i32, i32) {
    %c0_i32 = arith.constant 0 : i32
    %c0_i32_0 = arith.constant 0 : i32
    %c0_i32_1 = arith.constant 0 : i32
    return %c0_i32, %c0_i32_0 : i32, i32
  }
  func.func @transform_6(%arg0: i32) -> (i32, i32) {
    %c0_i32 = arith.constant 0 : i32
    %c0_i32_0 = arith.constant 0 : i32
    %c0_i32_1 = arith.constant 0 : i32
    return %c0_i32, %c0_i32_0 : i32, i32
  }
  func.func @transform_7(%arg0: i32) -> (i32, i32) {
    %c0_i32 = arith.constant 0 : i32
    %c0_i32_0 = arith.constant 0 : i32
    %c0_i32_1 = arith.constant 0 : i32
    return %c0_i32, %c0_i32_0 : i32, i32
  }
  func.func @transform_8(%arg0: i32) -> (i32, i32) {
    %c0_i32 = arith.constant 0 : i32
    %c0_i32_0 = arith.constant 0 : i32
    %c0_i32_1 = arith.constant 0 : i32
    return %c0_i32, %c0_i32_0 : i32, i32
  }
  func.func @transform_9(%arg0: i32) -> (i32, i32) {
    %c0_i32 = arith.constant 0 : i32
    %c0_i32_0 = arith.constant 0 : i32
    %c0_i32_1 = arith.constant 0 : i32
    return %c0_i32, %c0_i32_0 : i32, i32
  }
  func.func @transform_10(%arg0: i32) -> (i32, i32) {
    %c0_i32 = arith.constant 0 : i32
    %c0_i32_0 = arith.constant 0 : i32
    %c0_i32_1 = arith.constant 0 : i32
    return %c0_i32, %c0_i32_0 : i32, i32
  }
  func.func @transform_11(%arg0: i32) -> (i32, i32, i32) {
    %c0_i32 = arith.constant 0 : i32
    %c0_i32_0 = arith.constant 0 : i32
    %c0_i32_1 = arith.constant 0 : i32
    return %arg0, %c0_i32, %c0_i32_0 : i32, i32, i32
  }
}

module attributes {stable_mosaic.version = 11 : i64} {
  func.func @kernel(%arg0: i32, %arg1: memref<2x8x4xbf16, #tpu.memory_space<vmem>>, %arg2: memref<4x32xbf16, #tpu.memory_space<vmem>>, %arg3: memref<32x1xf32, #tpu.memory_space<vmem>>, %arg4: memref<1x32xf32, #tpu.memory_space<vmem>>, %arg5: memref<8x8xbf16, #tpu.memory_space<vmem>>, %arg6: memref<256x256xbf16, #tpu.memory_space<vmem>>, %arg7: memref<1x256xf32, #tpu.memory_space<vmem>>, %arg8: memref<256x128xbf16, #tpu.memory_space<vmem>>, %arg9: memref<1x128xf32, #tpu.memory_space<vmem>>, %arg10: memref<128x8xbf16, #tpu.memory_space<vmem>>, %arg11: memref<1x8xf32, #tpu.memory_space<vmem>>, %arg12: memref<1x2x8xf32, #tpu.memory_space<vmem>>) attributes {dimension_semantics = [#tpu.dimension_semantics<parallel>], iteration_bounds = array<i64: 1>, scalar_prefetch = 0 : i64, scratch_operands = 0 : i64, tpu.core_type = #tpu.core_type<tc>, window_params = [{transform_indices = @transform_0, window_bounds = array<i64: 2, 8, 4>}, {pipeline_mode = #tpu.pipeline_mode<synchronous>, transform_indices = @transform_1, window_bounds = array<i64: 4, 32>}, {pipeline_mode = #tpu.pipeline_mode<synchronous>, transform_indices = @transform_2, window_bounds = array<i64: 32, 1>}, {pipeline_mode = #tpu.pipeline_mode<synchronous>, transform_indices = @transform_3, window_bounds = array<i64: 1, 32>}, {pipeline_mode = #tpu.pipeline_mode<synchronous>, transform_indices = @transform_4, window_bounds = array<i64: 8, 8>}, {pipeline_mode = #tpu.pipeline_mode<synchronous>, transform_indices = @transform_5, window_bounds = array<i64: 256, 256>}, {pipeline_mode = #tpu.pipeline_mode<synchronous>, transform_indices = @transform_6, window_bounds = array<i64: 1, 256>}, {pipeline_mode = #tpu.pipeline_mode<synchronous>, transform_indices = @transform_7, window_bounds = array<i64: 256, 128>}, {pipeline_mode = #tpu.pipeline_mode<synchronous>, transform_indices = @transform_8, window_bounds = array<i64: 1, 128>}, {pipeline_mode = #tpu.pipeline_mode<synchronous>, transform_indices = @transform_9, window_bounds = array<i64: 128, 8>}, {pipeline_mode = #tpu.pipeline_mode<synchronous>, transform_indices = @transform_10, window_bounds = array<i64: 1, 8>}, {transform_indices = @transform_11, window_bounds = array<i64: 1, 2, 8>}]} {
    %c0 = arith.constant 0 : index
    %c0_0 = arith.constant 0 : index
    %c0_1 = arith.constant 0 : index
    %0 = vector.load %arg1[%c0, %c0_0, %c0_1] : memref<2x8x4xbf16, #tpu.memory_space<vmem>>, vector<2x8x4xbf16>
    %1 = vector.shape_cast %0 : vector<2x8x4xbf16> to vector<16x4xbf16>
    %c0_2 = arith.constant 0 : index
    %c0_3 = arith.constant 0 : index
    %2 = vector.load %arg2[%c0_2, %c0_3] : memref<4x32xbf16, #tpu.memory_space<vmem>>, vector<4x32xbf16>
    %cst = arith.constant dense<0.000000e+00> : vector<16x32xf32>
    %3 = tpu.matmul %1, %2, %cst {dimension_numbers = #tpu.dot_dimension_numbers<[1], [0], [0], [1], [0, 0, 1, 1], [], []>} : vector<16x4xbf16>, vector<4x32xbf16>, vector<16x32xf32> -> vector<16x32xf32>
    %4 = vector.shape_cast %3 : vector<16x32xf32> to vector<2x8x32xf32>
    %c0_4 = arith.constant 0 : index
    %c0_5 = arith.constant 0 : index
    %5 = vector.load %arg3[%c0_4, %c0_5] : memref<32x1xf32, #tpu.memory_space<vmem>>, vector<32x1xf32>
    %cst_6 = arith.constant dense<0.000000e+00> : vector<16x1xf32>
    %6 = tpu.matmul %3, %5, %cst_6 {dimension_numbers = #tpu.dot_dimension_numbers<[1], [0], [0], [1], [0, 0, 1, 1], [], []>} : vector<16x32xf32>, vector<32x1xf32>, vector<16x1xf32> -> vector<16x1xf32>
    %7 = vector.shape_cast %6 : vector<16x1xf32> to vector<2x8x1xf32>
    %c0_7 = arith.constant 0 : index
    %c0_8 = arith.constant 0 : index
    %8 = vector.load %arg4[%c0_7, %c0_8] : memref<1x32xf32, #tpu.memory_space<vmem>>, vector<1x32xf32>
    %9 = vector.shape_cast %8 : vector<1x32xf32> to vector<1x1x32xf32>
    %10 = vector.shape_cast %9 : vector<1x1x32xf32> to vector<1x1x32xf32>
    %11 = vector.broadcast %10 : vector<1x1x32xf32> to vector<2x1x32xf32>
    "tpu.trace_start"() <{level = 10 : i32, message = "bof,bjf->boj"}> : () -> ()
    %cst_9 = arith.constant dense<0.000000e+00> : vector<2x1x8xf32>
    %12 = tpu.matmul %11, %4, %cst_9 {dimension_numbers = #tpu.dot_dimension_numbers<[2], [2], [1], [1], [0, 0, 0, 1, 1, 1], [0], [0]>} : vector<2x1x32xf32>, vector<2x8x32xf32>, vector<2x1x8xf32> -> vector<2x1x8xf32>
    "tpu.trace_stop"() : () -> ()
    %13 = vector.broadcast %7 : vector<2x8x1xf32> to vector<2x8x8xf32>
    %14 = vector.broadcast %12 : vector<2x1x8xf32> to vector<2x8x8xf32>
    %15 = arith.addf %13, %14 : vector<2x8x8xf32>
    %cst_10 = arith.constant 0.000000e+00 : f32
    %16 = vector.broadcast %cst_10 : f32 to vector<2x8x8xf32>
    %17 = arith.cmpf ogt, %15, %16 : vector<2x8x8xf32>
    %cst_11 = arith.constant 0.00999999977 : f32
    %18 = vector.broadcast %cst_11 : f32 to vector<2x8x8xf32>
    %19 = arith.mulf %18, %15 : vector<2x8x8xf32>
    %20 = arith.select %17, %15, %19 : vector<2x8x8xi1>, vector<2x8x8xf32>
    %c0_12 = arith.constant 0 : index
    %c0_13 = arith.constant 0 : index
    %21 = vector.load %arg5[%c0_12, %c0_13] : memref<8x8xbf16, #tpu.memory_space<vmem>>, vector<8x8xbf16>
    %22 = arith.extf %21 : vector<8x8xbf16> to vector<8x8xf32>
    %23 = vector.shape_cast %22 : vector<8x8xf32> to vector<1x8x8xf32>
    %24 = vector.broadcast %23 : vector<1x8x8xf32> to vector<2x8x8xf32>
    %25 = arith.addf %20, %24 : vector<2x8x8xf32>
    %cst_14 = arith.constant dense<0xFF800000> : vector<2x8xf32>
    %26 = vector.multi_reduction <maximumf>, %25, %cst_14 [2] : vector<2x8x8xf32> to vector<2x8xf32>
    %27 = vector.shape_cast %26 : vector<2x8xf32> to vector<2x8x1xf32>
    %28 = vector.broadcast %27 : vector<2x8x1xf32> to vector<2x8x8xf32>
    %29 = arith.subf %25, %28 : vector<2x8x8xf32>
    %30 = math.exp %29 : vector<2x8x8xf32>
    %cst_15 = arith.constant dense<0.000000e+00> : vector<2x8xf32>
    %31 = vector.multi_reduction <add>, %30, %cst_15 [2] : vector<2x8x8xf32> to vector<2x8xf32>
    %32 = vector.shape_cast %31 : vector<2x8xf32> to vector<2x8x1xf32>
    %33 = tpu.reciprocal %32 {approx = true} : vector<2x8x1xf32> -> vector<2x8x1xf32>
    %34 = vector.broadcast %33 : vector<2x8x1xf32> to vector<2x8x8xf32>
    %35 = arith.mulf %30, %34 : vector<2x8x8xf32>
    %36 = arith.truncf %4 : vector<2x8x32xf32> to vector<2x8x32xbf16>
    %37 = arith.truncf %35 : vector<2x8x8xf32> to vector<2x8x8xbf16>
    "tpu.trace_start"() <{level = 10 : i32, message = "bij,bjf->bif"}> : () -> ()
    %cst_16 = arith.constant dense<0.000000e+00> : vector<2x8x32xf32>
    %38 = tpu.matmul %37, %36, %cst_16 {dimension_numbers = #tpu.dot_dimension_numbers<[2], [1], [1], [2], [0, 0, 0, 1, 1, 2], [0], [0]>} : vector<2x8x8xbf16>, vector<2x8x32xbf16>, vector<2x8x32xf32> -> vector<2x8x32xf32>
    "tpu.trace_stop"() : () -> ()
    %cst_17 = arith.constant 0.000000e+00 : f32
    %39 = vector.broadcast %cst_17 : f32 to vector<2x8x32xf32>
    %40 = arith.maximumf %38, %39 : vector<2x8x32xf32>
    %41 = vector.extract_strided_slice %40 {offsets = [0, 0, 0], sizes = [1, 8, 32], strides = [1, 1, 1]} : vector<2x8x32xf32> to vector<1x8x32xf32>
    %42 = vector.shape_cast %41 : vector<1x8x32xf32> to vector<8x32xf32>
    %43 = vector.extract_strided_slice %42 {offsets = [0, 0], sizes = [1, 32], strides = [1, 1]} : vector<8x32xf32> to vector<1x32xf32>
    %44 = vector.extract_strided_slice %42 {offsets = [1, 0], sizes = [1, 32], strides = [1, 1]} : vector<8x32xf32> to vector<1x32xf32>
    %45 = vector.extract_strided_slice %42 {offsets = [2, 0], sizes = [1, 32], strides = [1, 1]} : vector<8x32xf32> to vector<1x32xf32>
    %46 = vector.extract_strided_slice %42 {offsets = [3, 0], sizes = [1, 32], strides = [1, 1]} : vector<8x32xf32> to vector<1x32xf32>
    %47 = vector.extract_strided_slice %42 {offsets = [4, 0], sizes = [1, 32], strides = [1, 1]} : vector<8x32xf32> to vector<1x32xf32>
    %48 = vector.extract_strided_slice %42 {offsets = [5, 0], sizes = [1, 32], strides = [1, 1]} : vector<8x32xf32> to vector<1x32xf32>
    %49 = vector.extract_strided_slice %42 {offsets = [6, 0], sizes = [1, 32], strides = [1, 1]} : vector<8x32xf32> to vector<1x32xf32>
    %50 = vector.extract_strided_slice %42 {offsets = [7, 0], sizes = [1, 32], strides = [1, 1]} : vector<8x32xf32> to vector<1x32xf32>
    %51 = tpu.concatenate %43, %44, %45, %46, %47, %48, %49, %50 in 1 : vector<1x32xf32>, vector<1x32xf32>, vector<1x32xf32>, vector<1x32xf32>, vector<1x32xf32>, vector<1x32xf32>, vector<1x32xf32>, vector<1x32xf32> -> vector<1x256xf32>
    %52 = vector.extract_strided_slice %40 {offsets = [1, 0, 0], sizes = [1, 8, 32], strides = [1, 1, 1]} : vector<2x8x32xf32> to vector<1x8x32xf32>
    %53 = vector.shape_cast %52 : vector<1x8x32xf32> to vector<8x32xf32>
    %54 = vector.extract_strided_slice %53 {offsets = [0, 0], sizes = [1, 32], strides = [1, 1]} : vector<8x32xf32> to vector<1x32xf32>
    %55 = vector.extract_strided_slice %53 {offsets = [1, 0], sizes = [1, 32], strides = [1, 1]} : vector<8x32xf32> to vector<1x32xf32>
    %56 = vector.extract_strided_slice %53 {offsets = [2, 0], sizes = [1, 32], strides = [1, 1]} : vector<8x32xf32> to vector<1x32xf32>
    %57 = vector.extract_strided_slice %53 {offsets = [3, 0], sizes = [1, 32], strides = [1, 1]} : vector<8x32xf32> to vector<1x32xf32>
    %58 = vector.extract_strided_slice %53 {offsets = [4, 0], sizes = [1, 32], strides = [1, 1]} : vector<8x32xf32> to vector<1x32xf32>
    %59 = vector.extract_strided_slice %53 {offsets = [5, 0], sizes = [1, 32], strides = [1, 1]} : vector<8x32xf32> to vector<1x32xf32>
    %60 = vector.extract_strided_slice %53 {offsets = [6, 0], sizes = [1, 32], strides = [1, 1]} : vector<8x32xf32> to vector<1x32xf32>
    %61 = vector.extract_strided_slice %53 {offsets = [7, 0], sizes = [1, 32], strides = [1, 1]} : vector<8x32xf32> to vector<1x32xf32>
    %62 = tpu.concatenate %54, %55, %56, %57, %58, %59, %60, %61 in 1 : vector<1x32xf32>, vector<1x32xf32>, vector<1x32xf32>, vector<1x32xf32>, vector<1x32xf32>, vector<1x32xf32>, vector<1x32xf32>, vector<1x32xf32> -> vector<1x256xf32>
    %63 = tpu.concatenate %51, %62 in 0 : vector<1x256xf32>, vector<1x256xf32> -> vector<2x256xf32>
    %64 = arith.truncf %63 : vector<2x256xf32> to vector<2x256xbf16>
    %c0_18 = arith.constant 0 : index
    %c0_19 = arith.constant 0 : index
    %65 = vector.load %arg6[%c0_18, %c0_19] : memref<256x256xbf16, #tpu.memory_space<vmem>>, vector<256x256xbf16>
    %cst_20 = arith.constant dense<0.000000e+00> : vector<2x256xf32>
    %66 = tpu.matmul %64, %65, %cst_20 {dimension_numbers = #tpu.dot_dimension_numbers<[1], [0], [0], [1], [0, 0, 1, 1], [], []>} : vector<2x256xbf16>, vector<256x256xbf16>, vector<2x256xf32> -> vector<2x256xf32>
    %c0_21 = arith.constant 0 : index
    %c0_22 = arith.constant 0 : index
    %67 = vector.load %arg7[%c0_21, %c0_22] : memref<1x256xf32, #tpu.memory_space<vmem>>, vector<1x256xf32>
    %68 = vector.broadcast %67 : vector<1x256xf32> to vector<2x256xf32>
    %69 = arith.addf %66, %68 : vector<2x256xf32>
    %cst_23 = arith.constant 0.000000e+00 : f32
    %70 = vector.broadcast %cst_23 : f32 to vector<2x256xf32>
    %71 = arith.maximumf %69, %70 : vector<2x256xf32>
    %72 = arith.truncf %71 : vector<2x256xf32> to vector<2x256xbf16>
    %c0_24 = arith.constant 0 : index
    %c0_25 = arith.constant 0 : index
    %73 = vector.load %arg8[%c0_24, %c0_25] : memref<256x128xbf16, #tpu.memory_space<vmem>>, vector<256x128xbf16>
    %cst_26 = arith.constant dense<0.000000e+00> : vector<2x128xf32>
    %74 = tpu.matmul %72, %73, %cst_26 {dimension_numbers = #tpu.dot_dimension_numbers<[1], [0], [0], [1], [0, 0, 1, 1], [], []>} : vector<2x256xbf16>, vector<256x128xbf16>, vector<2x128xf32> -> vector<2x128xf32>
    %c0_27 = arith.constant 0 : index
    %c0_28 = arith.constant 0 : index
    %75 = vector.load %arg9[%c0_27, %c0_28] : memref<1x128xf32, #tpu.memory_space<vmem>>, vector<1x128xf32>
    %76 = vector.broadcast %75 : vector<1x128xf32> to vector<2x128xf32>
    %77 = arith.addf %74, %76 : vector<2x128xf32>
    %cst_29 = arith.constant 0.000000e+00 : f32
    %78 = vector.broadcast %cst_29 : f32 to vector<2x128xf32>
    %79 = arith.maximumf %77, %78 : vector<2x128xf32>
    %80 = arith.truncf %79 : vector<2x128xf32> to vector<2x128xbf16>
    %c0_30 = arith.constant 0 : index
    %c0_31 = arith.constant 0 : index
    %81 = vector.load %arg10[%c0_30, %c0_31] : memref<128x8xbf16, #tpu.memory_space<vmem>>, vector<128x8xbf16>
    %cst_32 = arith.constant dense<0.000000e+00> : vector<2x8xf32>
    %82 = tpu.matmul %80, %81, %cst_32 {dimension_numbers = #tpu.dot_dimension_numbers<[1], [0], [0], [1], [0, 0, 1, 1], [], []>} : vector<2x128xbf16>, vector<128x8xbf16>, vector<2x8xf32> -> vector<2x8xf32>
    %c0_33 = arith.constant 0 : index
    %c0_34 = arith.constant 0 : index
    %83 = vector.load %arg11[%c0_33, %c0_34] : memref<1x8xf32, #tpu.memory_space<vmem>>, vector<1x8xf32>
    %84 = vector.broadcast %83 : vector<1x8xf32> to vector<2x8xf32>
    %85 = arith.addf %82, %84 : vector<2x8xf32>
    %c0_35 = arith.constant 0 : index
    %c0_36 = arith.constant 0 : index
    %c0_37 = arith.constant 0 : index
    %86 = vector.load %arg12[%c0_35, %c0_36, %c0_37] : memref<1x2x8xf32, #tpu.memory_space<vmem>>, vector<1x2x8xf32>
    %87 = vector.shape_cast %86 : vector<1x2x8xf32> to vector<2x8xf32>
    %88 = vector.shape_cast %85 : vector<2x8xf32> to vector<1x2x8xf32>
    tpu.vector_store %arg12[%c0_35, %c0_36, %c0_37], %88 {strides = array<i32>} : memref<1x2x8xf32, #tpu.memory_space<vmem>>, vector<1x2x8xf32>,
    return
  }
  func.func @transform_0(%arg0: i32) -> (i32, i32, i32) {
    %c0_i32 = arith.constant 0 : i32
    %c0_i32_0 = arith.constant 0 : i32
    %c0_i32_1 = arith.constant 0 : i32
    return %arg0, %c0_i32, %c0_i32_0 : i32, i32, i32
  }
  func.func @transform_1(%arg0: i32) -> (i32, i32) {
    %c0_i32 = arith.constant 0 : i32
    %c0_i32_0 = arith.constant 0 : i32
    %c0_i32_1 = arith.constant 0 : i32
    return %c0_i32, %c0_i32_0 : i32, i32
  }
  func.func @transform_2(%arg0: i32) -> (i32, i32) {
    %c0_i32 = arith.constant 0 : i32
    %c0_i32_0 = arith.constant 0 : i32
    %c0_i32_1 = arith.constant 0 : i32
    return %c0_i32, %c0_i32_0 : i32, i32
  }
  func.func @transform_3(%arg0: i32) -> (i32, i32) {
    %c0_i32 = arith.constant 0 : i32
    %c0_i32_0 = arith.constant 0 : i32
    %c0_i32_1 = arith.constant 0 : i32
    return %c0_i32, %c0_i32_0 : i32, i32
  }
  func.func @transform_4(%arg0: i32) -> (i32, i32) {
    %c0_i32 = arith.constant 0 : i32
    %c0_i32_0 = arith.constant 0 : i32
    %c0_i32_1 = arith.constant 0 : i32
    return %c0_i32, %c0_i32_0 : i32, i32
  }
  func.func @transform_5(%arg0: i32) -> (i32, i32) {
    %c0_i32 = arith.constant 0 : i32
    %c0_i32_0 = arith.constant 0 : i32
    %c0_i32_1 = arith.constant 0 : i32
    return %c0_i32, %c0_i32_0 : i32, i32
  }
  func.func @transform_6(%arg0: i32) -> (i32, i32) {
    %c0_i32 = arith.constant 0 : i32
    %c0_i32_0 = arith.constant 0 : i32
    %c0_i32_1 = arith.constant 0 : i32
    return %c0_i32, %c0_i32_0 : i32, i32
  }
  func.func @transform_7(%arg0: i32) -> (i32, i32) {
    %c0_i32 = arith.constant 0 : i32
    %c0_i32_0 = arith.constant 0 : i32
    %c0_i32_1 = arith.constant 0 : i32
    return %c0_i32, %c0_i32_0 : i32, i32
  }
  func.func @transform_8(%arg0: i32) -> (i32, i32) {
    %c0_i32 = arith.constant 0 : i32
    %c0_i32_0 = arith.constant 0 : i32
    %c0_i32_1 = arith.constant 0 : i32
    return %c0_i32, %c0_i32_0 : i32, i32
  }
  func.func @transform_9(%arg0: i32) -> (i32, i32) {
    %c0_i32 = arith.constant 0 : i32
    %c0_i32_0 = arith.constant 0 : i32
    %c0_i32_1 = arith.constant 0 : i32
    return %c0_i32, %c0_i32_0 : i32, i32
  }
  func.func @transform_10(%arg0: i32) -> (i32, i32) {
    %c0_i32 = arith.constant 0 : i32
    %c0_i32_0 = arith.constant 0 : i32
    %c0_i32_1 = arith.constant 0 : i32
    return %c0_i32, %c0_i32_0 : i32, i32
  }
  func.func @transform_11(%arg0: i32) -> (i32, i32, i32) {
    %c0_i32 = arith.constant 0 : i32
    %c0_i32_0 = arith.constant 0 : i32
    %c0_i32_1 = arith.constant 0 : i32
    return %arg0, %c0_i32, %c0_i32_0 : i32, i32, i32
  }
}

</mosaic_0001>

<bundles_post_ra>
// kernel: tpu_custom_call.1
= control target key start
LH: loop header
LB: loop body
LE: loop exit
PB: predicated region body
PF: predicated region fallthrough
CT: control target
= control target key end

     0   :  { %16 = vsyncpa [#allocation3], 0  ;;  %s1745_s0 = inlined_call_operand.vmem [shape: bf16[2,8,4], index: 0, kind: input, shape index: {}]   ;;  %s1746_s1 = inlined_call_operand.vmem [shape: bf16[4,32], index: 1, kind: input, shape index: {}]   ;;  %s1747_s2 = inlined_call_operand.vmem [shape: f32[32,1], index: 2, kind: input, shape index: {}]   ;;  %s1748_s3 = inlined_call_operand.vmem [shape: f32[1,32], index: 3, kind: input, shape index: {}]   ;;  %s1749_s4 = inlined_call_operand.vmem [shape: bf16[8,8], index: 4, kind: input, shape index: {}]   ;;  %s1750_s5 = inlined_call_operand.hbm [shape: bf16[256,256], index: 5, kind: input, shape index: {}]   ;;  %s1751_s6 = inlined_call_operand.vmem [shape: f32[1,256], index: 6, kind: input, shape index: {}]   ;;  %s1752_s7 = inlined_call_operand.vmem [shape: bf16[256,128], index: 7, kind: input, shape index: {}]   ;;  %s1753_s8 = inlined_call_operand.vmem [shape: f32[1,128], index: 8, kind: input, shape index: {}]   ;;  %s1754_s9 = inlined_call_operand.vmem [shape: bf16[128,8], index: 9, kind: input, shape index: {}]   ;;  %s1755_s10 = inlined_call_operand.vmem [shape: f32[1,8], index: 10, kind: input, shape index: {}]   ;;  %s1756_s11 = inlined_call_operand.hbm [shape: f32[1,2,8], index: 11, kind: output, shape index: {}]  }
   0x1   :  { %17 = vsyncpa [#allocation4], 0  ;;  %s1486_s17 = smov [#allocation2]   ;;  %s1438_s21 = scalar_lea.hbm %s1750_s5, 4096 }
   0x2   :  { %s33_s18 = sshll.u32 %s1486_s17, 4  ;;  %p1439_p0 = scmp.ne.s32.totalorder %s1750_s5, %s1438_s21  ;;  %s34_s18 = int_to_ptr.vmem [resolvable:$true] %s33_s18 }
   0x3   :  { %p1442_p1 = scmp.lt.u32.totalorder %s1438_s21, %s1750_s5 }
   0x5   :  { %p1444_p2 = pnand %p1442_p1, %p1439_p0 }
   0x7   :  { %1447 = shalt.err (!%p1444_p2)
}
   0x8   :  { %s1448_s26 = scalar_lea.vmem %s34_s18, 4096  ;;  %p1453_p4 = scmp.lt.s32.totalorder %s34_s18, %s34_s18 }
   0x9   :  { %p1449_p3 = scmp.ne.s32.totalorder %s34_s18, %s1448_s26  ;;  %p1454_p5 = scmp.lt.s32.totalorder %s1448_s26, %s1448_s26 }
   0xb   :  { %p1455_p6 = por %p1454_p5, %p1453_p4 }
   0xd   :  { %p1456_p7 = pnand %p1455_p6, %p1449_p3 }
   0xf   :  { %1459 = shalt.err (!%p1456_p7)
}
  0x10   :  { %s1487_s27 = smov 128   ;;  %s1488_s28 = smov 8  }
  0x11   :  { %39 = dma.hbm_to_vmem [thread:$0]  %s1750_s5, 4096, %s34_s18, [#allocation3], %s1487_s27, %s1487_s27, %s1488_s28  }
  0x12   :  { %1482 = dma.done.wait [#allocation3], 4096  }
  0x13   :  { %1483 = vsyncadd [#allocation3], 4294963200  ;;  %v1489_v0 = vmov 0.0   ;;  %vm1490_vm0 = vmmov 0   ;;  %vm66_vm1 = vcmask 1041408   ;;  %v1357_v3 = vld [vmem:[%s1745_s0] sm:$0xff]   ;;  %v351_v26 = vlaneseq }
  0x14   :  { %1262 = vmatprep.subr.bf16.mxu0 %v1489_v0  ;;  %1264 = vmatprep.mubr.msk.bf16.mxu0 %vm1490_vm0, %v1489_v0  ;;  %v56_v1 = vld [vmem:[%s1746_s1] sm:$0x3]  ;;  %v112_v5 = vld [vmem:[%s1747_s2 + $0x8] sm:$0xff]  ;;  %vm62_vm2 = vcmask 31744   ;;  %v113_v7 = vld [vmem:[%s1747_s2 + $0x10] sm:$0xff]  ;;  %vm115_vm3 = vcmask 261120  }
  0x15   :  { %v68_v2 = vsel %vm66_vm1, %v56_v1, 0  ;;  %v111_v4 = vld [vmem:[%s1747_s2] sm:$0xff]  ;;  %v114_v8 = vld [vmem:[%s1747_s2 + $0x18] sm:$0xff]  ;;  %vm401_vm4 = vcmask 1043456   ;;  %v1491_v19 = vmov 0   ;;  %v1614_v27 = vshrl.u32 %v351_v26, 7 }
  0x16   :  { %1263 = vmatpush3.bf16.msra.mxu0 %v68_v2  ;;  %v1321_v6 = vpack.c.bf16 %v112_v5, %v111_v4  ;;  %v1325_v9 = vpack.c.bf16 %v114_v8, %v113_v7  ;;  %v197_v13 = vld [vmem:[%s1748_s3] sm:$0x1]  ;;  %1341 = vset.pattern.permute.xlu0 %v1491_v19  ;;  %vm371_vm6 = vcmask 64512   ;;  %v1360_v1 = vld [vmem:[#allocation2 + $0x4] ss:$8 sps:$4 sm:$0xff]   ;;  %s1495_s29 = smov 32  }
  0x17   :  { %1279 = vmatprep.subr.mxu0 %v1489_v0  ;;  %v1617_v28 = vsub.s32 0, %v1614_v27  ;;  %v367_v30 = vld [vmem:[%s1749_s4] sm:$0xf]  ;;  %v1363_v2 = vld [vmem:[#allocation2 + $0x14] ss:$8 sps:$4 sm:$0xff]   ;;  %s1494_s4 = smov 64  }
  0x18   :  { %1322 = vmatprep.subr.bf16.mxu1 %v1321_v6  ;;  %v368_v34 = vunpack.c.l.bf16 %v367_v30  ;;  %v1358_v63 = vld [vmem:[#allocation2] ss:$8 sps:$4 sm:$0xff]   ;;  %v1366_v4 = vld [vmem:[#allocation2 + $0x24] ss:$8 sps:$4 sm:$0xff]   ;;  %v1367_v7 = vld [vmem:[#allocation2 + $0x30] ss:$8 sps:$4 sm:$0xff]  }
  0x19   :  { %1265 = vmatmul.mubr.msk.bf16.vlgmr.msra.gmra.mrb[0].mxu0 %vm62_vm2, %v1357_v3  ;;  %1324 = vmatpush3.bf16.msra.mxu1 %v1321_v6  ;;  %v1361_v3 = vld [vmem:[#allocation2 + $0x10] ss:$8 sps:$4 sm:$0xff]   ;;  %v1364_v5 = vld [vmem:[#allocation2 + $0x20] ss:$8 sps:$4 sm:$0xff]   ;;  %v1369_v6 = vld [vmem:[#allocation2 + $0x34] ss:$8 sps:$4 sm:$0xff]  }
  0x1a   :  { %1326 = vmatprep.subr.bf16.mxu1 %v1325_v9  ;;  %1281 = vmatprep.mubr.msk.f32.mxu0 %vm1490_vm0, %v1489_v0  ;;  %v1372_v8 = vld [vmem:[#allocation2 + $0x44] ss:$8 sps:$4 sm:$0xff]   ;;  %v1385_v19 = vld [vmem:[#allocation2 + $0x90] ss:$8 sps:$4 sm:$0xff]   ;;  %v1492_v26 = vmov 1983009808  }
  0x1b   :  { %s1496_s15 = smov 96   ;;  %vm584_vm8 = vcmask 523264   ;;  %vm586_vm9 = vcmask 785408   ;;  %s1497_s27 = smov [#allocation5]   ;;  %vm1130_vm10 = vcmask 58368  }
  0x1d   :  { %1328 = vmatpush3.bf16.msra.mxu1 %v1325_v9  ;;  %v1370_v9 = vld [vmem:[#allocation2 + $0x40] ss:$8 sps:$4 sm:$0xff]  }
  0x1e   :  { %1284 = vmatprep.subr.mxu1 %v1489_v0 }
  0xec   :  { %v104_v10 = vpop.f32.mrb[0].mxu0 }
  0xed   :  { %v394_v11 = vpack.c.bf16 %v104_v10, %v104_v10  ;;  %v1266_v12 = vpop.f32.mrb[1].mxu0  ;;  %1276 = vmatprep.mubr.msk.f32.mxu1 %vm115_vm3, %v104_v10  ;;  %1280 = vmatpush3.xpose.msk.msra.mxu0 %vm115_vm3, %v104_v10  ;;  %v1375_v10 = vld [vmem:[#allocation2 + $0x54] ss:$8 sps:$4 sm:$0xff]  }
  0xee   :  { %v107_v14 = vpop.f32.mrb[2].mxu0  ;;  %1289 = vmatprep.subr.bf16.mxu0 %v1489_v0  ;;  %v1378_v12 = vld [vmem:[#allocation2 + $0x64] ss:$8 sps:$4 sm:$0xff]  }
  0xef   :  { %v395_v15 = vpack.c.bf16 %v107_v14, %v107_v14  ;;  %v1267_v16 = vpop.f32.mrb[3].mxu0  ;;  %1277 = vmatmul.mubr.msk.f32.vlgmr.msra.gmra.mrb[0].mxu1 %vm115_vm3, %v107_v14  ;;  %v403_v17 = vsel %vm401_vm4, %v394_v11, 0  ;;  %v1373_v11 = vld [vmem:[#allocation2 + $0x50] ss:$8 sps:$4 sm:$0xff]  }
  0xf0   :  { %1285 = vmatpush3.xpose.msk.msra.mxu1 %vm115_vm3, %v107_v14  ;;  %1282 = vmatmul.mubr.msk.f32.vlgmr.msra.gmra.mrb[4].mxu0 %vm115_vm3, %v197_v13  ;;  %v1381_v14 = vld [vmem:[#allocation2 + $0x74] ss:$8 sps:$4 sm:$0xff]   ;;  %v1384_v16 = vld [vmem:[#allocation2 + $0x84] ss:$8 sps:$4 sm:$0xff]  }
  0xf1   :  { %1290 = vmatpush3.bf16.msra.mxu0 %v403_v17  ;;  %1286 = vmatprep.mubr.msk.f32.mxu1 %vm1490_vm0, %v1489_v0  ;;  %v449_v18 = vsel %vm401_vm4, %v395_v15, 0  ;;  %v1379_v15 = vld [vmem:[#allocation2 + $0x70] ss:$8 sps:$4 sm:$0xff]   ;;  %v1382_v17 = vld [vmem:[#allocation2 + $0x80] ss:$8 sps:$4 sm:$0xff]  }
  0xf2   :  { %1295 = vmatprep.subr.bf16.mxu1 %v1489_v0  ;;  %1291 = vmatprep.mubr.msk.bf16.mxu0 %vm1490_vm0, %v1489_v0 }
  0xf3   :  { %1287 = vmatmul.mubr.msk.f32.vlgmr.msra.gmra.mrb[2].mxu1 %vm115_vm3, %v197_v13  ;;  %797 = vmatprep.subr.bf16.mxu0 %v1360_v1  ;;  %v1376_v13 = vld [vmem:[#allocation2 + $0x60] ss:$8 sps:$4 sm:$0xff]   ;;  %v1405_v1 = vld [vmem:[#allocation2 + $0xf4] ss:$8 sps:$4 sm:$0xff]  }
  0xf4   :  { %1296 = vmatpush3.bf16.msra.mxu1 %v449_v18  ;;  %1297 = vmatprep.mubr.msk.bf16.mxu1 %vm1490_vm0, %v1489_v0  ;;  %v1387_v18 = vld [vmem:[#allocation2 + $0x94] ss:$8 sps:$4 sm:$0xff]  }
 0x1c2   :  { %v1278_v20 = vpop.f32.mrb[0].mxu1 }
 0x1c3   :  { %v188_v21 = vpop.f32.mrb[1].mxu1  ;;  %v267_v22 = vpop.f32.mrb[4].mxu0 }
 0x1c4   :  { %343 = vperm.xlu0 %1341, %v188_v21   ;;  %v1283_v23 = vpop.f32.mrb[5].mxu0  ;;  %v354_v29 = vrot.slane %v267_v22, %v1617_v28  ;;  %v1388_v21 = vld [vmem:[#allocation2 + $0xa0] ss:$8 sps:$4 sm:$0xff]   ;;  %v1393_v22 = vld [vmem:[#allocation2 + $0xb4] ss:$8 sps:$4 sm:$0xff]  }
 0x1c5   :  { %v1391_v23 = vld [vmem:[#allocation2 + $0xb0] ss:$8 sps:$4 sm:$0xff]  }
 0x1c6   :  { %v337_v24 = vpop.f32.mrb[2].mxu1 }
 0x1c7   :  { %v1288_v25 = vpop.f32.mrb[3].mxu1  ;;  %v358_v33 = vrot.slane %v337_v24, %v1617_v28  ;;  %v1396_v24 = vld [vmem:[#allocation2 + $0xc4] ss:$8 sps:$4 sm:$0xff]  }
 0x1c8   :  { %348 = vperm.xlu0 %1341, %v1278_v20   ;;  %v1390_v20 = vld [vmem:[#allocation2 + $0xa4] ss:$8 sps:$4 sm:$0xff]   ;;  %v1394_v25 = vld [vmem:[#allocation2 + $0xc0] ss:$8 sps:$4 sm:$0xff]  }
 0x243   :  { %v344_v31 = vpop.permute.xlu0 %343 }
 0x244   :  { %v359_v32 = vadd.f32 %v354_v29, %v344_v31  ;;  %v495_v29 = vunpack.c.l.s4 %v1492_v26  ;;  %v1493_v31 = vmov 1934713408  }
 0x246   :  { %v363_v35 = vmul.f32 0.01, %v359_v32  ;;  %vm361_vm5 = vcmp.gt.f32.partialorder %v359_v32, 0.0  ;;  %v496_v30 = vunpack.c.0.s8 %v495_v29 }
 0x247   :  { %v349_v36 = vpop.permute.xlu0 %348 }
 0x248   :  { %v360_v37 = vadd.f32 %v358_v33, %v349_v36  ;;  %v365_v38 = vsel %vm361_vm5, %v359_v32, %v363_v35  ;;  %v526_v32 = vunpack.c.l.s4 %v1493_v31 }
 0x249   :  { %v369_v39 = vadd.f32 %v368_v34, %v365_v38 }
 0x24a   :  { %vm362_vm7 = vcmp.gt.f32.partialorder %v360_v37, 0.0  ;;  %v364_v40 = vmul.f32 0.01, %v360_v37 }
 0x24b   :  { %v372_v41 = vsel %vm371_vm6, %v369_v39, -inf }
 0x24c   :  { %373 = vmax.xlane.f32.xlu1 %v372_v41  ;;  %v366_v42 = vsel %vm362_vm7, %v360_v37, %v364_v40  ;;  %v499_v37 = vsub.s32 %v496_v30, %v1614_v27  ;;  %v1397_v41 = vld [vmem:[#allocation2 + $0xd0] ss:$8 sps:$4 sm:$0xff]  }
 0x24d   :  { %v370_v43 = vadd.f32 %v368_v34, %v366_v42  ;;  %v1399_v42 = vld [vmem:[#allocation2 + $0xd4] ss:$8 sps:$4 sm:$0xff]  }
 0x24f   :  { %v375_v44 = vsel %vm371_vm6, %v370_v43, -inf }
 0x250   :  { %376 = vmax.xlane.f32.xlu1 %v375_v44 }
 0x2d9   :  { %v374_v45 = vpop.xlane.xlu1 %373 }
 0x2da   :  { %v378_v46 = vsub.f32 %v369_v39, %v374_v45  ;;  %v527_v39 = vunpack.c.0.s8 %v526_v32 }
 0x2dc   :  { %v380_v47 = vmul.f32 1.442695, %v378_v46 }
 0x2dd   :  { %v377_v48 = vpop.xlane.xlu1 %376 }
 0x2de   :  { %1430 = vpow2.f32 %v380_v47  ;;  %v379_v49 = vsub.f32 %v370_v43, %v377_v48 }
 0x2e0   :  { %v382_v50 = vmul.f32 1.442695, %v379_v49 }
 0x2e2   :  { %1432 = vpow2.f32 %v382_v50  ;;  %v530_v50 = vsub.s32 %v527_v39, %v1614_v27 }
 0x2e8   :  { %v1431_v51 = vpop.eup %1430 }
 0x2e9   :  { %v384_v52 = vsel %vm371_vm6, %v1431_v51, 0.0 }
 0x2ea   :  { %385 = vadd.xlane.f32.xlu0 %v384_v52 }
 0x2ec   :  { %v1433_v53 = vpop.eup %1432 }
 0x2ed   :  { %v387_v54 = vsel %vm371_vm6, %v1433_v53, 0.0 }
 0x2ee   :  { %388 = vadd.xlane.f32.xlu1 %v387_v54 }
 0x377   :  { %v386_v55 = vpop.xlane.xlu0 %385 }
 0x378   :  { %1434 = vrcp.f32 %v386_v55 }
 0x37b   :  { %v389_v56 = vpop.xlane.xlu1 %388 }
 0x37c   :  { %1436 = vrcp.f32 %v389_v56  ;;  %v1402_v56 = vld [vmem:[#allocation2 + $0xe4] ss:$8 sps:$4 sm:$0xff]  }
 0x382   :  { %v1435_v57 = vpop.eup %1434 }
 0x383   :  { %v392_v58 = vmul.f32 %v1435_v57, %v1431_v51  ;;  %v1400_v57 = vld [vmem:[#allocation2 + $0xe0] ss:$8 sps:$4 sm:$0xff]  }
 0x385   :  { %v396_v59 = vpack.c.bf16 %v392_v58, %v392_v58 }
 0x386   :  { %v1437_v60 = vpop.eup %1436 }
 0x387   :  { %v393_v61 = vmul.f32 %v1437_v60, %v1433_v53  ;;  %1292 = vmatmul.mubr.msk.bf16.vlgmr.msra.gmra.mrb[8].mxu0 %vm371_vm6, %v396_v59 }
 0x388   :  { %798 = vmatpush1.bf16.msra.mxu0 %v1358_v63 }
 0x389   :  { %v397_v62 = vpack.c.bf16 %v393_v61, %v393_v61  ;;  %799 = vmatprep.subr.bf16.mxu0 %v1363_v2  ;;  %v1403_v2 = vld [vmem:[#allocation2 + $0xf0] ss:$8 sps:$4 sm:$0xff]  }
 0x38b   :  { %1298 = vmatmul.mubr.msk.bf16.vlgmr.msra.gmra.mrb[4].mxu1 %vm371_vm6, %v397_v62 }
 0x38c   :  { %800 = vmatpush1.bf16.msra.mxu0 %v1361_v3 }
 0x38d   :  { %801 = vmatprep.subr.bf16.mxu0 %v1366_v4 }
 0x390   :  { %802 = vmatpush1.bf16.msra.mxu0 %v1364_v5 }
 0x391   :  { %803 = vmatprep.subr.bf16.mxu0 %v1369_v6 }
 0x394   :  { %804 = vmatpush1.bf16.msra.mxu0 %v1367_v7 }
 0x395   :  { %805 = vmatprep.subr.bf16.mxu0 %v1372_v8 }
 0x398   :  { %806 = vmatpush1.bf16.msra.mxu0 %v1370_v9  ;;  %v1406_v9 = vld [vmem:[%s1752_s7 + $0x40] sm:$0xff]  }
 0x399   :  { %807 = vmatprep.subr.bf16.mxu0 %v1375_v10  ;;  %v1407_v10 = vld [vmem:[%s1752_s7] sm:$0xff]   ;;  %1231 = vmatprep.subr.bf16.mxu1 %v1406_v9 }
 0x39a   :  { %1232 = vmatpush3.bf16.msra.mxu1 %v1407_v10 }
 0x39c   :  { %808 = vmatpush1.bf16.msra.mxu0 %v1373_v11  ;;  %v1408_v11 = vld [vmem:[%s1752_s7 + $0x48] sm:$0xff]  }
 0x39d   :  { %809 = vmatprep.subr.bf16.mxu0 %v1378_v12  ;;  %1233 = vmatprep.subr.bf16.mxu1 %v1408_v11 }
 0x3a0   :  { %810 = vmatpush1.bf16.msra.mxu0 %v1376_v13  ;;  %v1409_v13 = vld [vmem:[%s1752_s7 + $0x8] sm:$0xff]  }
 0x3a1   :  { %811 = vmatprep.subr.bf16.mxu0 %v1381_v14  ;;  %v1410_v14 = vld [vmem:[%s1752_s7 + $0x50] sm:$0xff]   ;;  %1234 = vmatpush3.bf16.msra.mxu1 %v1409_v13 }
 0x3a2   :  { %1235 = vmatprep.subr.bf16.mxu1 %v1410_v14 }
 0x3a4   :  { %812 = vmatpush1.bf16.msra.mxu0 %v1379_v15  ;;  %v1411_v15 = vld [vmem:[%s1752_s7 + $0x10] sm:$0xff]  }
 0x3a5   :  { %813 = vmatprep.subr.bf16.mxu0 %v1384_v16  ;;  %v1412_v16 = vld [vmem:[%s1752_s7 + $0x58] sm:$0xff]   ;;  %1236 = vmatpush3.bf16.msra.mxu1 %v1411_v15 }
 0x3a6   :  { %1237 = vmatprep.subr.bf16.mxu1 %v1412_v16 }
 0x3a8   :  { %814 = vmatpush1.bf16.msra.mxu0 %v1382_v17  ;;  %v1413_v17 = vld [vmem:[%s1752_s7 + $0x18] sm:$0xff]  }
 0x3a9   :  { %815 = vmatprep.subr.bf16.mxu0 %v1387_v18  ;;  %v1414_v18 = vld [vmem:[%s1752_s7 + $0x60] sm:$0xff]   ;;  %1238 = vmatpush3.bf16.msra.mxu1 %v1413_v17 }
 0x3aa   :  { %1239 = vmatprep.subr.bf16.mxu1 %v1414_v18 }
 0x3ac   :  { %816 = vmatpush1.bf16.msra.mxu0 %v1385_v19  ;;  %v1415_v19 = vld [vmem:[%s1752_s7 + $0x20] sm:$0xff]  }
 0x3ad   :  { %817 = vmatprep.subr.bf16.mxu0 %v1390_v20  ;;  %v1416_v20 = vld [vmem:[%s1752_s7 + $0x68] sm:$0xff]   ;;  %1240 = vmatpush3.bf16.msra.mxu1 %v1415_v19 }
 0x3ae   :  { %1241 = vmatprep.subr.bf16.mxu1 %v1416_v20 }
 0x3b0   :  { %818 = vmatpush1.bf16.msra.mxu0 %v1388_v21  ;;  %v1417_v21 = vld [vmem:[%s1752_s7 + $0x28] sm:$0xff]  }
 0x3b1   :  { %819 = vmatprep.subr.bf16.mxu0 %v1393_v22  ;;  %1242 = vmatpush3.bf16.msra.mxu1 %v1417_v21 }
 0x3b4   :  { %820 = vmatpush1.bf16.msra.mxu0 %v1391_v23 }
 0x3b5   :  { %821 = vmatprep.subr.bf16.mxu0 %v1396_v24 }
 0x3b8   :  { %822 = vmatpush1.bf16.msra.mxu0 %v1394_v25 }
 0x3b9   :  { %823 = vmatprep.subr.bf16.mxu0 %v1399_v42  ;;  %v1419_v42 = vld [vmem:[%s1752_s7 + $0x30] sm:$0xff]  }
 0x3bc   :  { %824 = vmatpush1.bf16.msra.mxu0 %v1397_v41  ;;  %v1418_v41 = vld [vmem:[%s1752_s7 + $0x70] sm:$0xff]  }
 0x3bd   :  { %825 = vmatprep.subr.bf16.mxu0 %v1402_v56  ;;  %1243 = vmatprep.subr.bf16.mxu1 %v1418_v41 }
 0x3be   :  { %1244 = vmatpush3.bf16.msra.mxu1 %v1419_v42 }
 0x3c0   :  { %826 = vmatpush1.bf16.msra.mxu0 %v1400_v57 }
 0x3c1   :  { %827 = vmatprep.subr.bf16.mxu0 %v1405_v1  ;;  %v1429_v1 = vld [vmem:[%s1754_s9 + $0x38] sm:$0xff]  }
 0x3c4   :  { %828 = vmatpush1.bf16.msra.mxu0 %v1403_v2 }
 0x45a   :  { %v439_v33 = vpop.f32.mrb[8].mxu0 }
 0x45b   :  { %v491_v34 = vmax.f32 %v439_v33, 0.0  ;;  %v1293_v35 = vpop.f32.mrb[9].mxu0 }
 0x45c   :  { %v442_v36 = vpop.f32.mrb[10].mxu0 }
 0x45d   :  { %v1294_v38 = vpop.f32.mrb[11].mxu0  ;;  %v493_v43 = vcombine.high %v491_v34, %v1489_v0  ;;  %v500_v47 = vrot.slane %v491_v34, %v499_v37 }
 0x45e   :  { %v485_v40 = vpop.f32.mrb[4].mxu1 }
 0x45f   :  { %v492_v44 = vmax.f32 %v485_v40, 0.0  ;;  %v1299_v45 = vpop.f32.mrb[5].mxu1  ;;  %v507_v52 = vrot.slane %v493_v43, %v499_v37  ;;  %v1420_v43 = vld [vmem:[%s1752_s7 + $0x78] sm:$0xff]  }
 0x460   :  { %v488_v46 = vpop.f32.mrb[6].mxu1  ;;  %1245 = vmatprep.subr.bf16.mxu1 %v1420_v43  ;;  %v625_v45 = vld [vmem:[%s1751_s6] sm:$0x3] }
 0x461   :  { %v508_v48 = vcombine.high %v492_v44, %v1489_v0  ;;  %v515_v49 = vrot.slane %v492_v44, %v499_v37  ;;  %v1300_v51 = vpop.f32.mrb[7].mxu1  ;;  %v1421_v44 = vld [vmem:[%s1752_s7 + $0x38] sm:$0xff]   ;;  %v633_v46 = vsub.s32 1, %v1614_v27  ;;  %v1423_v27 = vld [vmem:[%s1754_s9 + $0x8] sm:$0xff]  }
 0x462   :  { %1246 = vmatpush3.bf16.msra.mxu1 %v1421_v44 }
 0x463   :  { %v522_v53 = vrot.slane %v508_v48, %v499_v37  ;;  %v523_v54 = vcombine.low %v500_v47, %v515_v49  ;;  %v524_v55 = vcombine.high %v500_v47, %v515_v49  ;;  %1301 = vmatprep.subr.bf16.mxu1 %v1489_v0  ;;  %v630_v47 = vrot.slane %v625_v45, %v1617_v28  ;;  %v1424_v28 = vld [vmem:[%s1754_s9 + $0x10] sm:$0xff]  }
 0x464   :  { %v634_v48 = vrot.slane %v625_v45, %v633_v46 }
 0x465   :  { %v539_v58 = vcombine.low %v507_v52, %v522_v53  ;;  %v540_v59 = vcombine.high %v507_v52, %v522_v53  ;;  %v538_v60 = vrot.slane %v524_v55, %v530_v50  ;;  %v531_v61 = vrot.slane %v523_v54, %v530_v50 }
 0x467   :  { %v554_v62 = vrot.slane %v540_v59, %v530_v50  ;;  %v547_v63 = vrot.slane %v539_v58, %v530_v50  ;;  %v556_v5 = vcombine.high %v538_v60, %v1489_v0  ;;  %v555_v7 = vcombine.high %v531_v61, %v1489_v0  ;;  %v1422_v58 = vld [vmem:[%s1754_s9] sm:$0xff]  }
 0x469   :  { %v1342_v3 = vpack.i.bf16 %v538_v60, %v554_v62  ;;  %v557_v4 = vcombine.high %v547_v63, %v1489_v0  ;;  %v558_v6 = vcombine.high %v554_v62, %v1489_v0  ;;  %v1425_v60 = vld [vmem:[%s1754_s9 + $0x18] sm:$0xff]   ;;  %v1427_v62 = vld [vmem:[%s1754_s9 + $0x28] sm:$0xff]  }
 0x46b   :  { %1343 = vrot.lane.b32.xlu1 %v1342_v3, %s1494_s4  ;;  %v1352_v8 = vpack.i.bf16 %v556_v5, %v558_v6  ;;  %v1347_v12 = vpack.i.bf16 %v555_v7, %v557_v4  ;;  %v1189_v3 = vld [vmem:[%s1753_s8] ss:$0 sm:$0xff] }
 0x46f   :  { %1348 = vrot.lane.b32.xlu1 %v1347_v12, %s1495_s29 }
 0x473   :  { %1353 = vrot.lane.b32.xlu1 %v1352_v8, %s1496_s15 }
 0x4dd   :  { %v1344_v22 = vpop.permute.xlu1 %1343 }
 0x4de   :  { %v1346_v30 = vunpack.i.h.bf16 %v1344_v22  ;;  %v1345_v31 = vunpack.i.l.bf16 %v1344_v22 }
 0x4e1   :  { %v1349_v23 = vpop.permute.xlu1 %1348 }
 0x4e2   :  { %v1351_v24 = vunpack.i.h.bf16 %v1349_v23  ;;  %v1350_v25 = vunpack.i.l.bf16 %v1349_v23 }
 0x4e4   :  { %v583_v26 = vsel %vm115_vm3, %v531_v61, %v1351_v24  ;;  %v588_v29 = vsel %vm115_vm3, %v547_v63, %v1350_v25  ;;  %v1426_v61 = vld [vmem:[%s1754_s9 + $0x20] sm:$0xff]   ;;  %v1428_v63 = vld [vmem:[%s1754_s9 + $0x30] sm:$0xff]   ;;  %s1138_s9 = sshll.u32 %s1497_s27, 4  ;;  %s1139_s9 = int_to_ptr.vmem [resolvable:$true] %s1138_s9 }
 0x4e5   :  { %v1354_v32 = vpop.permute.xlu1 %1353  ;;  %v585_v35 = vsel %vm584_vm8, %v583_v26, %v1346_v30  ;;  %v589_v36 = vsel %vm584_vm8, %v588_v29, %v1345_v31  ;;  %s1460_s8 = scalar_lea.vmem %s1139_s9, 32  ;;  %p1465_p9 = scmp.lt.s32.totalorder %s1139_s9, %s1139_s9 }
 0x4e6   :  { %v1356_v33 = vunpack.i.h.bf16 %v1354_v32  ;;  %v1355_v34 = vunpack.i.l.bf16 %v1354_v32  ;;  %p1461_p8 = scmp.ne.s32.totalorder %s1139_s9, %s1460_s8  ;;  %p1466_p10 = scmp.lt.s32.totalorder %s1460_s8, %s1460_s8 }
 0x4e8   :  { %v587_v37 = vsel %vm586_vm9, %v585_v35, %v1356_v33  ;;  %v590_v38 = vsel %vm586_vm9, %v589_v36, %v1355_v34  ;;  %p1467_p11 = por %p1466_p10, %p1465_p9 }
 0x4e9   :  { %v591_v39 = vpack.c.bf16 %v587_v37, %v587_v37  ;;  %v592_v40 = vpack.c.bf16 %v590_v38, %v590_v38 }
 0x4ea   :  { %p1468_p12 = pnand %p1467_p11, %p1461_p8 }
 0x4eb   :  { %829 = vmatprep.mubr.bf16.mxu0 %v592_v40 }
 0x4ec   :  { %830 = vmatmul.mubr.bf16.vlgmr.msra.gmra.mrb[12].mxu0 %v591_v39 }
 0x5bf   :  { %v831_v49 = vpop.f32.mrb[12].mxu0 }
 0x5c0   :  { %v832_v50 = vadd.f32 %v831_v49, %v630_v47  ;;  %v833_v51 = vpop.f32.mrb[13].mxu0 }
 0x5c1   :  { %v834_v52 = vadd.f32 %v833_v51, %v634_v48  ;;  %v835_v53 = vpop.f32.mrb[14].mxu0 }
 0x5c2   :  { %v838_v54 = vmax.f32 %v832_v50, 0.0  ;;  %v836_v55 = vpop.f32.mrb[15].mxu0 }
 0x5c3   :  { %v839_v56 = vmax.f32 %v834_v52, 0.0 }
 0x5c4   :  { %v840_v59 = vpack.c.bf16 %v838_v54, %v838_v54 }
 0x5c5   :  { %v841_v57 = vpack.c.bf16 %v839_v56, %v839_v56 }
 0x5c7   :  { %1009 = vmatprep.mubr.bf16.mxu1 %v841_v57 }
 0x5c8   :  { %1010 = vmatmul.mubr.bf16.vlgmr.msra.gmra.mrb[8].mxu1 %v840_v59 }
 0x5c9   :  { %1302 = vmatpush3.bf16.msra.mxu1 %v1422_v58  ;;  %1317 = vmatprep.mubr.msk.bf16.mxu1 %vm1490_vm0, %v1489_v0 }
 0x5ca   :  { %1303 = vmatprep.subr.bf16.mxu1 %v1489_v0 }
 0x5cd   :  { %1304 = vmatpush3.bf16.msra.mxu1 %v1423_v27 }
 0x5ce   :  { %1305 = vmatprep.subr.bf16.mxu1 %v1489_v0 }
 0x5d1   :  { %1306 = vmatpush3.bf16.msra.mxu1 %v1424_v28 }
 0x5d2   :  { %1307 = vmatprep.subr.bf16.mxu1 %v1489_v0 }
 0x5d5   :  { %1308 = vmatpush3.bf16.msra.mxu1 %v1425_v60 }
 0x5d6   :  { %1309 = vmatprep.subr.bf16.mxu1 %v1489_v0 }
 0x5d9   :  { %1310 = vmatpush3.bf16.msra.mxu1 %v1426_v61 }
 0x5da   :  { %1311 = vmatprep.subr.bf16.mxu1 %v1489_v0 }
 0x5dd   :  { %1312 = vmatpush3.bf16.msra.mxu1 %v1427_v62 }
 0x5de   :  { %1313 = vmatprep.subr.bf16.mxu1 %v1489_v0 }
 0x5e1   :  { %1314 = vmatpush3.bf16.msra.mxu1 %v1428_v63 }
 0x5e2   :  { %1315 = vmatprep.subr.bf16.mxu1 %v1489_v0  ;;  %v1206_v0 = vld [vmem:[%s1755_s10] ss:$0 sm:$0xff] }
 0x5e5   :  { %1316 = vmatpush3.bf16.msra.mxu1 %v1429_v1 }
 0x69b   :  { %v1247_v2 = vpop.f32.mrb[8].mxu1 }
 0x69c   :  { %v1248_v4 = vpop.f32.mrb[9].mxu1 }
 0x69d   :  { %v1249_v5 = vadd.f32 %v1248_v4, %v1247_v2  ;;  %v1250_v6 = vpop.f32.mrb[10].mxu1 }
 0x69e   :  { %v1251_v7 = vpop.f32.mrb[11].mxu1 }
 0x69f   :  { %v1012_v8 = vadd.f32 %v1249_v5, %v1189_v3 }
 0x6a1   :  { %v1017_v9 = vmax.f32 %v1012_v8, 0.0 }
 0x6a3   :  { %v1018_v10 = vpack.c.bf16 %v1017_v9, %v1017_v9 }
 0x6a5   :  { %1318 = vmatmul.mubr.bf16.vlgmr.msra.gmra.mrb[12].mxu1 %v1018_v10 }
 0x778   :  { %v1124_v11 = vpop.f32.mrb[12].mxu1 }
 0x779   :  { %v1125_v12 = vadd.f32 %v1206_v0, %v1124_v11  ;;  %v1319_v13 = vpop.f32.mrb[13].mxu1 }
 0x77a   :  { %v1127_v14 = vpop.f32.mrb[14].mxu1 }
 0x77b   :  { %v1320_v15 = vpop.f32.mrb[15].mxu1  ;;  %1131 = vst.msk [vmem:[#allocation5] sm:$0x3] %vm1130_vm10, %v1125_v12 }
 0x77c   :  { %1471 = shalt.err (!%p1468_p12)
}
 0x77d   :  { %s1472_s10 = scalar_lea.hbm %s1756_s11, 32 }
 0x77e   :  { %p1473_p13 = scmp.ne.s32.totalorder %s1756_s11, %s1472_s10  ;;  %p1476_p0 = scmp.lt.u32.totalorder %s1472_s10, %s1756_s11 }
 0x780   :  { %p1478_p1 = pnand %p1476_p0, %p1473_p13 }
 0x782   :  { %1481 = shalt.err (!%p1478_p1)
}
 0x783   :  { %1141 = dma.vmem_to_hbm [thread:$0]  %s1139_s9, 32, %s1756_s11, [#allocation4]  }
 0x784   :  { %1484 = dma.done.wait [#allocation4], 32  }
 0x785   :  { %1485 = vsyncadd [#allocation4], 4294967264 }
 0x786   :  { %1145 = vsyncpa [#allocation3], 1 }
 0x787   :  { %1146 = vsyncpa [#allocation4], 1 }

// kernel: tpu_custom_call.1
= control target key start
LH: loop header
LB: loop body
LE: loop exit
PB: predicated region body
PF: predicated region fallthrough
CT: control target
= control target key end

     0   :  { %16 = vsyncpa [#allocation3], 0  ;;  %s1759_s0 = inlined_call_operand.vmem [shape: bf16[2,8,4], index: 0, kind: input, shape index: {}]   ;;  %s1760_s1 = inlined_call_operand.vmem [shape: bf16[4,32], index: 1, kind: input, shape index: {}]   ;;  %s1761_s2 = inlined_call_operand.vmem [shape: f32[32,1], index: 2, kind: input, shape index: {}]   ;;  %s1762_s3 = inlined_call_operand.vmem [shape: f32[1,32], index: 3, kind: input, shape index: {}]   ;;  %s1763_s4 = inlined_call_operand.vmem [shape: bf16[8,8], index: 4, kind: input, shape index: {}]   ;;  %s1764_s5 = inlined_call_operand.hbm [shape: bf16[256,256], index: 5, kind: input, shape index: {}]   ;;  %s1765_s6 = inlined_call_operand.vmem [shape: f32[1,256], index: 6, kind: input, shape index: {}]   ;;  %s1766_s7 = inlined_call_operand.vmem [shape: bf16[256,128], index: 7, kind: input, shape index: {}]   ;;  %s1767_s8 = inlined_call_operand.vmem [shape: f32[1,128], index: 8, kind: input, shape index: {}]   ;;  %s1768_s9 = inlined_call_operand.vmem [shape: bf16[128,8], index: 9, kind: input, shape index: {}]   ;;  %s1769_s10 = inlined_call_operand.vmem [shape: f32[1,8], index: 10, kind: input, shape index: {}]   ;;  %s1770_s11 = inlined_call_operand.hbm [shape: f32[1,2,8], index: 11, kind: output, shape index: {}]  }
   0x1   :  { %17 = vsyncpa [#allocation4], 0  ;;  %s1478_s17 = smov [#allocation2]   ;;  %s1430_s21 = scalar_lea.hbm %s1764_s5, 4096 }
   0x2   :  { %s33_s18 = sshll.u32 %s1478_s17, 4  ;;  %p1431_p0 = scmp.ne.s32.totalorder %s1764_s5, %s1430_s21  ;;  %s34_s18 = int_to_ptr.vmem [resolvable:$true] %s33_s18 }
   0x3   :  { %p1434_p1 = scmp.lt.u32.totalorder %s1430_s21, %s1764_s5 }
   0x5   :  { %p1436_p2 = pnand %p1434_p1, %p1431_p0 }
   0x7   :  { %1439 = shalt.err (!%p1436_p2)
}
   0x8   :  { %s1440_s26 = scalar_lea.vmem %s34_s18, 4096  ;;  %p1445_p4 = scmp.lt.s32.totalorder %s34_s18, %s34_s18 }
   0x9   :  { %p1441_p3 = scmp.ne.s32.totalorder %s34_s18, %s1440_s26  ;;  %p1446_p5 = scmp.lt.s32.totalorder %s1440_s26, %s1440_s26 }
   0xb   :  { %p1447_p6 = por %p1446_p5, %p1445_p4 }
   0xd   :  { %p1448_p7 = pnand %p1447_p6, %p1441_p3 }
   0xf   :  { %1451 = shalt.err (!%p1448_p7)
}
  0x10   :  { %s1479_s27 = smov 128   ;;  %s1480_s28 = smov 8  }
  0x11   :  { %39 = dma.hbm_to_vmem [thread:$0]  %s1764_s5, 4096, %s34_s18, [#allocation3], %s1479_s27, %s1479_s27, %s1480_s28  }
  0x12   :  { %1474 = dma.done.wait [#allocation3], 4096  }
  0x13   :  { %1475 = vsyncadd [#allocation3], 4294963200  ;;  %v1481_v0 = vmov 0.0   ;;  %vm1482_vm0 = vmmov 0   ;;  %vm66_vm1 = vcmask 1041408   ;;  %v1349_v3 = vld [vmem:[%s1759_s0] sm:$0xff]   ;;  %v351_v26 = vlaneseq }
  0x14   :  { %1241 = vmatprep.subr.bf16.mxu0 %v1481_v0  ;;  %1243 = vmatprep.mubr.msk.bf16.mxu0 %vm1482_vm0, %v1481_v0  ;;  %v56_v1 = vld [vmem:[%s1760_s1] sm:$0x3]  ;;  %v112_v5 = vld [vmem:[%s1761_s2 + $0x8] sm:$0xff]  ;;  %vm62_vm2 = vcmask 31744   ;;  %v113_v7 = vld [vmem:[%s1761_s2 + $0x10] sm:$0xff]  ;;  %v1483_v10 = vmov 0  }
  0x15   :  { %v68_v2 = vsel %vm66_vm1, %v56_v1, 0  ;;  %v111_v4 = vld [vmem:[%s1761_s2] sm:$0xff]  ;;  %v114_v8 = vld [vmem:[%s1761_s2 + $0x18] sm:$0xff]  ;;  %1318 = vset.pattern.permute.xlu0 %v1483_v10  ;;  %vm115_vm3 = vcmask 261120   ;;  %vm401_vm4 = vcmask 1043456   ;;  %v1604_v27 = vshrl.u32 %v351_v26, 7 }
  0x16   :  { %1242 = vmatpush3.bf16.msra.mxu0 %v68_v2  ;;  %v1300_v6 = vpack.c.bf16 %v112_v5, %v111_v4  ;;  %v1304_v9 = vpack.c.bf16 %v114_v8, %v113_v7  ;;  %v197_v14 = vld [vmem:[%s1762_s3] sm:$0x1]  ;;  %vm371_vm6 = vcmask 64512   ;;  %v1352_v1 = vld [vmem:[#allocation2 + $0x4] ss:$8 sps:$4 sm:$0xff]   ;;  %s1485_s23 = smov 64  }
  0x17   :  { %1258 = vmatprep.subr.mxu0 %v1481_v0  ;;  %v1607_v28 = vsub.s32 0, %v1604_v27  ;;  %v367_v30 = vld [vmem:[%s1763_s4] sm:$0xf]  ;;  %v1355_v2 = vld [vmem:[#allocation2 + $0x14] ss:$8 sps:$4 sm:$0xff]   ;;  %s1484_s4 = smov 32  }
  0x18   :  { %1301 = vmatprep.subr.bf16.mxu1 %v1300_v6  ;;  %v368_v34 = vunpack.c.l.bf16 %v367_v30  ;;  %v1350_v63 = vld [vmem:[#allocation2] ss:$8 sps:$4 sm:$0xff]   ;;  %v1358_v4 = vld [vmem:[#allocation2 + $0x24] ss:$8 sps:$4 sm:$0xff]   ;;  %v1359_v7 = vld [vmem:[#allocation2 + $0x30] ss:$8 sps:$4 sm:$0xff]  }
  0x19   :  { %1244 = vmatmul.mubr.msk.bf16.vlgmr.msra.gmra.mrb[0].mxu0 %vm62_vm2, %v1349_v3  ;;  %1303 = vmatpush3.bf16.msra.mxu1 %v1300_v6  ;;  %v1353_v3 = vld [vmem:[#allocation2 + $0x10] ss:$8 sps:$4 sm:$0xff]   ;;  %v1356_v5 = vld [vmem:[#allocation2 + $0x20] ss:$8 sps:$4 sm:$0xff]   ;;  %v1361_v6 = vld [vmem:[#allocation2 + $0x34] ss:$8 sps:$4 sm:$0xff]  }
  0x1a   :  { %1305 = vmatprep.subr.bf16.mxu1 %v1304_v9  ;;  %1260 = vmatprep.mubr.msk.f32.mxu0 %vm1482_vm0, %v1481_v0  ;;  %v1364_v8 = vld [vmem:[#allocation2 + $0x44] ss:$8 sps:$4 sm:$0xff]   ;;  %v1367_v10 = vld [vmem:[#allocation2 + $0x54] ss:$8 sps:$4 sm:$0xff]   ;;  %s1486_s24 = smov 96   ;;  %vm521_vm8 = vcmask 523264  }
  0x1b   :  { %v1388_v26 = vld [vmem:[#allocation2 + $0xc4] ss:$8 sps:$4 sm:$0xff]   ;;  %vm523_vm9 = vcmask 785408   ;;  %vm567_vm10 = vcmask 1040384   ;;  %s1487_s27 = smov [#allocation5]   ;;  %vm1109_vm11 = vcmask 58368  }
  0x1d   :  { %1307 = vmatpush3.bf16.msra.mxu1 %v1304_v9  ;;  %v1362_v9 = vld [vmem:[#allocation2 + $0x40] ss:$8 sps:$4 sm:$0xff]  }
  0x1e   :  { %1263 = vmatprep.subr.mxu1 %v1481_v0 }
  0xec   :  { %v104_v11 = vpop.f32.mrb[0].mxu0 }
  0xed   :  { %v394_v12 = vpack.c.bf16 %v104_v11, %v104_v11  ;;  %v1245_v13 = vpop.f32.mrb[1].mxu0  ;;  %1255 = vmatprep.mubr.msk.f32.mxu1 %vm115_vm3, %v104_v11  ;;  %1259 = vmatpush3.xpose.msk.msra.mxu0 %vm115_vm3, %v104_v11  ;;  %v1365_v11 = vld [vmem:[#allocation2 + $0x50] ss:$8 sps:$4 sm:$0xff]  }
  0xee   :  { %v107_v15 = vpop.f32.mrb[2].mxu0  ;;  %1268 = vmatprep.subr.bf16.mxu0 %v1481_v0  ;;  %v1368_v13 = vld [vmem:[#allocation2 + $0x60] ss:$8 sps:$4 sm:$0xff]  }
  0xef   :  { %v395_v16 = vpack.c.bf16 %v107_v15, %v107_v15  ;;  %v1246_v17 = vpop.f32.mrb[3].mxu0  ;;  %1256 = vmatmul.mubr.msk.f32.vlgmr.msra.gmra.mrb[0].mxu1 %vm115_vm3, %v107_v15  ;;  %v403_v18 = vsel %vm401_vm4, %v394_v12, 0  ;;  %v1370_v12 = vld [vmem:[#allocation2 + $0x64] ss:$8 sps:$4 sm:$0xff]  }
  0xf0   :  { %1264 = vmatpush3.xpose.msk.msra.mxu1 %vm115_vm3, %v107_v15  ;;  %1261 = vmatmul.mubr.msk.f32.vlgmr.msra.gmra.mrb[4].mxu0 %vm115_vm3, %v197_v14  ;;  %v1371_v15 = vld [vmem:[#allocation2 + $0x70] ss:$8 sps:$4 sm:$0xff]   ;;  %v1374_v17 = vld [vmem:[#allocation2 + $0x80] ss:$8 sps:$4 sm:$0xff]  }
  0xf1   :  { %1269 = vmatpush3.bf16.msra.mxu0 %v403_v18  ;;  %1265 = vmatprep.mubr.msk.f32.mxu1 %vm1482_vm0, %v1481_v0  ;;  %v449_v19 = vsel %vm401_vm4, %v395_v16, 0  ;;  %v1376_v16 = vld [vmem:[#allocation2 + $0x84] ss:$8 sps:$4 sm:$0xff]   ;;  %v1379_v18 = vld [vmem:[#allocation2 + $0x94] ss:$8 sps:$4 sm:$0xff]  }
  0xf2   :  { %1274 = vmatprep.subr.bf16.mxu1 %v1481_v0  ;;  %1270 = vmatprep.mubr.msk.bf16.mxu0 %vm1482_vm0, %v1481_v0 }
  0xf3   :  { %1266 = vmatmul.mubr.msk.f32.vlgmr.msra.gmra.mrb[2].mxu1 %vm115_vm3, %v197_v14  ;;  %776 = vmatprep.subr.bf16.mxu0 %v1352_v1  ;;  %v1373_v14 = vld [vmem:[#allocation2 + $0x74] ss:$8 sps:$4 sm:$0xff]   ;;  %v1401_v1 = vld [vmem:[%s1766_s7 + $0x8] sm:$0xff]  }
  0xf4   :  { %1275 = vmatpush3.bf16.msra.mxu1 %v449_v19  ;;  %1276 = vmatprep.mubr.msk.bf16.mxu1 %vm1482_vm0, %v1481_v0  ;;  %v1377_v19 = vld [vmem:[#allocation2 + $0x90] ss:$8 sps:$4 sm:$0xff]  }
 0x1c2   :  { %v1257_v20 = vpop.f32.mrb[0].mxu1 }
 0x1c3   :  { %348 = vperm.xlu0 %1318, %v1257_v20   ;;  %v188_v21 = vpop.f32.mrb[1].mxu1  ;;  %v267_v22 = vpop.f32.mrb[4].mxu0  ;;  %v1382_v20 = vld [vmem:[#allocation2 + $0xa4] ss:$8 sps:$4 sm:$0xff]  }
 0x1c4   :  { %v1262_v24 = vpop.f32.mrb[5].mxu0  ;;  %v354_v33 = vrot.slane %v267_v22, %v1607_v28  ;;  %v1383_v22 = vld [vmem:[#allocation2 + $0xb0] ss:$8 sps:$4 sm:$0xff]  }
 0x1c6   :  { %v337_v23 = vpop.f32.mrb[2].mxu1 }
 0x1c7   :  { %343 = vperm.xlu0 %1318, %v188_v21   ;;  %v1267_v25 = vpop.f32.mrb[3].mxu1  ;;  %v358_v29 = vrot.slane %v337_v23, %v1607_v28  ;;  %v1380_v21 = vld [vmem:[#allocation2 + $0xa0] ss:$8 sps:$4 sm:$0xff]   ;;  %v1385_v23 = vld [vmem:[#allocation2 + $0xb4] ss:$8 sps:$4 sm:$0xff]  }
 0x1c8   :  { %v1386_v25 = vld [vmem:[#allocation2 + $0xc0] ss:$8 sps:$4 sm:$0xff]  }
 0x242   :  { %v349_v31 = vpop.permute.xlu0 %348 }
 0x243   :  { %v360_v32 = vadd.f32 %v358_v29, %v349_v31 }
 0x245   :  { %v364_v35 = vmul.f32 0.01, %v360_v32  ;;  %vm362_vm5 = vcmp.gt.f32.partialorder %v360_v32, 0.0 }
 0x246   :  { %v344_v36 = vpop.permute.xlu0 %343 }
 0x247   :  { %v359_v37 = vadd.f32 %v354_v33, %v344_v36  ;;  %v366_v38 = vsel %vm362_vm5, %v360_v32, %v364_v35  ;;  %v1391_v36 = vld [vmem:[#allocation2 + $0xd4] ss:$8 sps:$4 sm:$0xff]  }
 0x248   :  { %v370_v39 = vadd.f32 %v368_v34, %v366_v38 }
 0x249   :  { %vm361_vm7 = vcmp.gt.f32.partialorder %v359_v37, 0.0  ;;  %v363_v40 = vmul.f32 0.01, %v359_v37 }
 0x24a   :  { %v375_v41 = vsel %vm371_vm6, %v370_v39, -inf }
 0x24b   :  { %376 = vmax.xlane.f32.xlu1 %v375_v41  ;;  %v365_v42 = vsel %vm361_vm7, %v359_v37, %v363_v40 }
 0x24c   :  { %v369_v43 = vadd.f32 %v368_v34, %v365_v42  ;;  %v1389_v42 = vld [vmem:[#allocation2 + $0xd0] ss:$8 sps:$4 sm:$0xff]  }
 0x24e   :  { %v372_v44 = vsel %vm371_vm6, %v369_v43, -inf }
 0x24f   :  { %373 = vmax.xlane.f32.xlu1 %v372_v44 }
 0x2d8   :  { %v377_v45 = vpop.xlane.xlu1 %376 }
 0x2d9   :  { %v379_v46 = vsub.f32 %v370_v39, %v377_v45 }
 0x2db   :  { %v382_v47 = vmul.f32 1.442695, %v379_v46 }
 0x2dc   :  { %v374_v48 = vpop.xlane.xlu1 %373 }
 0x2dd   :  { %1422 = vpow2.f32 %v382_v47  ;;  %v378_v49 = vsub.f32 %v369_v43, %v374_v48 }
 0x2df   :  { %v380_v50 = vmul.f32 1.442695, %v378_v49 }
 0x2e1   :  { %1424 = vpow2.f32 %v380_v50 }
 0x2e7   :  { %v1423_v51 = vpop.eup %1422 }
 0x2e8   :  { %v387_v52 = vsel %vm371_vm6, %v1423_v51, 0.0 }
 0x2e9   :  { %388 = vadd.xlane.f32.xlu0 %v387_v52  ;;  %v1394_v52 = vld [vmem:[#allocation2 + $0xe4] ss:$8 sps:$4 sm:$0xff]  }
 0x2eb   :  { %v1425_v53 = vpop.eup %1424 }
 0x2ec   :  { %v384_v54 = vsel %vm371_vm6, %v1425_v53, 0.0 }
 0x2ed   :  { %385 = vadd.xlane.f32.xlu1 %v384_v54 }
 0x376   :  { %v389_v55 = vpop.xlane.xlu0 %388 }
 0x377   :  { %1426 = vrcp.f32 %v389_v55 }
 0x37a   :  { %v386_v56 = vpop.xlane.xlu1 %385 }
 0x37b   :  { %1428 = vrcp.f32 %v386_v56 }
 0x381   :  { %v1427_v57 = vpop.eup %1426 }
 0x382   :  { %v393_v58 = vmul.f32 %v1427_v57, %v1423_v51  ;;  %v1392_v51 = vld [vmem:[#allocation2 + $0xe0] ss:$8 sps:$4 sm:$0xff]   ;;  %v1395_v57 = vld [vmem:[#allocation2 + $0xf0] ss:$8 sps:$4 sm:$0xff]  }
 0x384   :  { %v397_v59 = vpack.c.bf16 %v393_v58, %v393_v58 }
 0x385   :  { %v1429_v60 = vpop.eup %1428 }
 0x386   :  { %v392_v61 = vmul.f32 %v1429_v60, %v1425_v53  ;;  %1277 = vmatmul.mubr.msk.bf16.vlgmr.msra.gmra.mrb[4].mxu1 %vm371_vm6, %v397_v59  ;;  %v1397_v53 = vld [vmem:[#allocation2 + $0xf4] ss:$8 sps:$4 sm:$0xff]  }
 0x388   :  { %v396_v62 = vpack.c.bf16 %v392_v61, %v392_v61  ;;  %v1398_v61 = vld [vmem:[%s1766_s7 + $0x40] sm:$0xff]  }
 0x389   :  { %1210 = vmatprep.subr.bf16.mxu1 %v1398_v61 }
 0x38a   :  { %1271 = vmatmul.mubr.msk.bf16.vlgmr.msra.gmra.mrb[8].mxu0 %vm371_vm6, %v396_v62  ;;  %v1399_v62 = vld [vmem:[%s1766_s7] sm:$0xff]  }
 0x38b   :  { %777 = vmatpush1.bf16.msra.mxu0 %v1350_v63  ;;  %v1400_v63 = vld [vmem:[%s1766_s7 + $0x48] sm:$0xff]   ;;  %1211 = vmatpush3.bf16.msra.mxu1 %v1399_v62 }
 0x38c   :  { %778 = vmatprep.subr.bf16.mxu0 %v1355_v2  ;;  %1212 = vmatprep.subr.bf16.mxu1 %v1400_v63 }
 0x38f   :  { %779 = vmatpush1.bf16.msra.mxu0 %v1353_v3  ;;  %v1402_v3 = vld [vmem:[%s1766_s7 + $0x50] sm:$0xff]   ;;  %1213 = vmatpush3.bf16.msra.mxu1 %v1401_v1 }
 0x390   :  { %780 = vmatprep.subr.bf16.mxu0 %v1358_v4  ;;  %v1403_v4 = vld [vmem:[%s1766_s7 + $0x10] sm:$0xff]   ;;  %1214 = vmatprep.subr.bf16.mxu1 %v1402_v3 }
 0x393   :  { %781 = vmatpush1.bf16.msra.mxu0 %v1356_v5  ;;  %v1404_v5 = vld [vmem:[%s1766_s7 + $0x58] sm:$0xff]   ;;  %1215 = vmatpush3.bf16.msra.mxu1 %v1403_v4 }
 0x394   :  { %782 = vmatprep.subr.bf16.mxu0 %v1361_v6  ;;  %v1405_v6 = vld [vmem:[%s1766_s7 + $0x18] sm:$0xff]   ;;  %1216 = vmatprep.subr.bf16.mxu1 %v1404_v5  ;;  %v1414_v5 = vld [vmem:[%s1768_s9] sm:$0xff]  }
 0x397   :  { %783 = vmatpush1.bf16.msra.mxu0 %v1359_v7  ;;  %v1406_v7 = vld [vmem:[%s1766_s7 + $0x60] sm:$0xff]   ;;  %1217 = vmatpush3.bf16.msra.mxu1 %v1405_v6 }
 0x398   :  { %784 = vmatprep.subr.bf16.mxu0 %v1364_v8  ;;  %v1407_v8 = vld [vmem:[%s1766_s7 + $0x20] sm:$0xff]   ;;  %1218 = vmatprep.subr.bf16.mxu1 %v1406_v7  ;;  %v1417_v7 = vld [vmem:[%s1768_s9 + $0x18] sm:$0xff]  }
 0x39b   :  { %785 = vmatpush1.bf16.msra.mxu0 %v1362_v9  ;;  %v1408_v9 = vld [vmem:[%s1766_s7 + $0x68] sm:$0xff]   ;;  %1219 = vmatpush3.bf16.msra.mxu1 %v1407_v8  ;;  %v1418_v8 = vld [vmem:[%s1768_s9 + $0x20] sm:$0xff]  }
 0x39c   :  { %786 = vmatprep.subr.bf16.mxu0 %v1367_v10  ;;  %v1409_v10 = vld [vmem:[%s1766_s7 + $0x28] sm:$0xff]   ;;  %1220 = vmatprep.subr.bf16.mxu1 %v1408_v9 }
 0x39d   :  { %v1419_v9 = vld [vmem:[%s1768_s9 + $0x28] sm:$0xff]  }
 0x39f   :  { %787 = vmatpush1.bf16.msra.mxu0 %v1365_v11  ;;  %1221 = vmatpush3.bf16.msra.mxu1 %v1409_v10  ;;  %v1420_v10 = vld [vmem:[%s1768_s9 + $0x30] sm:$0xff]  }
 0x3a0   :  { %788 = vmatprep.subr.bf16.mxu0 %v1370_v12 }
 0x3a3   :  { %789 = vmatpush1.bf16.msra.mxu0 %v1368_v13 }
 0x3a4   :  { %790 = vmatprep.subr.bf16.mxu0 %v1373_v14 }
 0x3a7   :  { %791 = vmatpush1.bf16.msra.mxu0 %v1371_v15 }
 0x3a8   :  { %792 = vmatprep.subr.bf16.mxu0 %v1376_v16 }
 0x3ab   :  { %793 = vmatpush1.bf16.msra.mxu0 %v1374_v17 }
 0x3ac   :  { %794 = vmatprep.subr.bf16.mxu0 %v1379_v18 }
 0x3af   :  { %795 = vmatpush1.bf16.msra.mxu0 %v1377_v19 }
 0x3b0   :  { %796 = vmatprep.subr.bf16.mxu0 %v1382_v20 }
 0x3b3   :  { %797 = vmatpush1.bf16.msra.mxu0 %v1380_v21 }
 0x3b4   :  { %798 = vmatprep.subr.bf16.mxu0 %v1385_v23 }
 0x3b7   :  { %799 = vmatpush1.bf16.msra.mxu0 %v1383_v22 }
 0x3b8   :  { %800 = vmatprep.subr.bf16.mxu0 %v1388_v26 }
 0x3bb   :  { %801 = vmatpush1.bf16.msra.mxu0 %v1386_v25 }
 0x3bc   :  { %802 = vmatprep.subr.bf16.mxu0 %v1391_v36 }
 0x3bf   :  { %803 = vmatpush1.bf16.msra.mxu0 %v1389_v42 }
 0x3c0   :  { %804 = vmatprep.subr.bf16.mxu0 %v1394_v52  ;;  %v1411_v52 = vld [vmem:[%s1766_s7 + $0x30] sm:$0xff]  }
 0x3c3   :  { %805 = vmatpush1.bf16.msra.mxu0 %v1392_v51  ;;  %v1410_v51 = vld [vmem:[%s1766_s7 + $0x70] sm:$0xff]  }
 0x3c4   :  { %806 = vmatprep.subr.bf16.mxu0 %v1397_v53  ;;  %1222 = vmatprep.subr.bf16.mxu1 %v1410_v51  ;;  %v1412_v53 = vld [vmem:[%s1766_s7 + $0x78] sm:$0xff]  }
 0x3c5   :  { %1223 = vmatpush3.bf16.msra.mxu1 %v1411_v52 }
 0x3c6   :  { %1224 = vmatprep.subr.bf16.mxu1 %v1412_v53 }
 0x3c7   :  { %807 = vmatpush1.bf16.msra.mxu0 %v1395_v57 }
 0x459   :  { %v485_v24 = vpop.f32.mrb[4].mxu1 }
 0x45a   :  { %v1620_v29 = vmax.f32 %v485_v24, 0.0  ;;  %v1278_v30 = vpop.f32.mrb[5].mxu1 }
 0x45b   :  { %v488_v31 = vpop.f32.mrb[6].mxu1 }
 0x45c   :  { %v1279_v32 = vpop.f32.mrb[7].mxu1  ;;  %v529_v33 = vrot.slane %v1620_v29, 1  ;;  %v543_v34 = vrot.slane %v1620_v29, 5  ;;  %v533_v40 = vrot.slane %v1620_v29, 2  ;;  %v547_v41 = vrot.slane %v1620_v29, 6 }
 0x45d   :  { %v439_v35 = vpop.f32.mrb[8].mxu0  ;;  %v537_v49 = vrot.slane %v1620_v29, 3  ;;  %v551_v50 = vrot.slane %v1620_v29, 7  ;;  %v541_v18 = vrot.slane %v1620_v29, 4 }
 0x45e   :  { %v1624_v37 = vmax.f32 %v439_v35, 0.0  ;;  %v1272_v38 = vpop.f32.mrb[9].mxu0  ;;  %v1319_v39 = vpack.i.bf16 %v529_v33, %v543_v34  ;;  %v1324_v47 = vpack.i.bf16 %v533_v40, %v547_v41 }
 0x45f   :  { %v442_v43 = vpop.f32.mrb[10].mxu0  ;;  %v1329_v54 = vpack.i.bf16 %v537_v49, %v551_v50 }
 0x460   :  { %1320 = vrot.lane.b32.xlu1 %v1319_v39, %s1484_s4  ;;  %v1273_v44 = vpop.f32.mrb[11].mxu0  ;;  %v498_v45 = vrot.slane %v1624_v37, 2  ;;  %v512_v46 = vrot.slane %v1624_v37, 6  ;;  %v494_v55 = vrot.slane %v1624_v37, 1  ;;  %v508_v56 = vrot.slane %v1624_v37, 5 }
 0x461   :  { %v502_v59 = vrot.slane %v1624_v37, 3  ;;  %v516_v60 = vrot.slane %v1624_v37, 7  ;;  %v506_v21 = vrot.slane %v1624_v37, 4 }
 0x462   :  { %v1339_v48 = vpack.i.bf16 %v498_v45, %v512_v46  ;;  %v1334_v58 = vpack.i.bf16 %v494_v55, %v508_v56  ;;  %v604_v55 = vld [vmem:[%s1765_s6] sm:$0x3]  ;;  %v612_v56 = vsub.s32 1, %v1604_v27  ;;  %v1415_v27 = vld [vmem:[%s1768_s9 + $0x8] sm:$0xff]  }
 0x463   :  { %v1344_v2 = vpack.i.bf16 %v502_v59, %v516_v60  ;;  %v609_v57 = vrot.slane %v604_v55, %v1607_v28  ;;  %v1416_v28 = vld [vmem:[%s1768_s9 + $0x10] sm:$0xff]  }
 0x464   :  { %1325 = vrot.lane.b32.xlu1 %v1324_v47, %s1485_s23  ;;  %1340 = vrot.lane.b32.xlu0 %v1339_v48, %s1485_s23 }
 0x468   :  { %1330 = vrot.lane.b32.xlu1 %v1329_v54, %s1486_s24  ;;  %v1413_v54 = vld [vmem:[%s1766_s7 + $0x38] sm:$0xff]  }
 0x469   :  { %1225 = vmatpush3.bf16.msra.mxu1 %v1413_v54 }
 0x46a   :  { %1280 = vmatprep.subr.bf16.mxu1 %v1481_v0 }
 0x46c   :  { %1335 = vrot.lane.b32.xlu1 %v1334_v58, %s1484_s4  ;;  %v613_v58 = vrot.slane %v604_v55, %v612_v56 }
 0x470   :  { %1345 = vrot.lane.b32.xlu1 %v1344_v2, %s1486_s24 }
 0x4d2   :  { %v1321_v11 = vpop.permute.xlu1 %1320 }
 0x4d3   :  { %v1323_v14 = vunpack.i.h.bf16 %v1321_v11  ;;  %v1322_v15 = vunpack.i.l.bf16 %v1321_v11  ;;  %v1421_v11 = vld [vmem:[%s1768_s9 + $0x38] sm:$0xff]   ;;  %s1117_s9 = sshll.u32 %s1487_s27, 4  ;;  %s1118_s9 = int_to_ptr.vmem [resolvable:$true] %s1117_s9 }
 0x4d4   :  { %p1457_p9 = scmp.lt.s32.totalorder %s1118_s9, %s1118_s9 }
 0x4d5   :  { %v555_v23 = vsel %vm115_vm3, %v1620_v29, %v1323_v14  ;;  %v558_v24 = vsel %vm115_vm3, %v541_v18, %v1322_v15 }
 0x4d6   :  { %v1326_v12 = vpop.permute.xlu1 %1325  ;;  %v1341_v25 = vpop.permute.xlu0 %1340 }
 0x4d7   :  { %v1328_v16 = vunpack.i.h.bf16 %v1326_v12  ;;  %v1327_v17 = vunpack.i.l.bf16 %v1326_v12  ;;  %v1343_v38 = vunpack.i.h.bf16 %v1341_v25  ;;  %v1342_v29 = vunpack.i.l.bf16 %v1341_v25 }
 0x4d9   :  { %v556_v31 = vsel %vm521_vm8, %v555_v23, %v1328_v16  ;;  %v559_v32 = vsel %vm521_vm8, %v558_v24, %v1327_v17 }
 0x4da   :  { %v1331_v13 = vpop.permute.xlu1 %1330 }
 0x4db   :  { %v1333_v19 = vunpack.i.h.bf16 %v1331_v13  ;;  %v1332_v20 = vunpack.i.l.bf16 %v1331_v13  ;;  %v1168_v13 = vld [vmem:[%s1767_s8] ss:$0 sm:$0xff]  ;;  %s1452_s8 = scalar_lea.vmem %s1118_s9, 32 }
 0x4dc   :  { %p1453_p8 = scmp.ne.s32.totalorder %s1118_s9, %s1452_s8  ;;  %p1458_p10 = scmp.lt.s32.totalorder %s1452_s8, %s1452_s8 }
 0x4dd   :  { %v557_v33 = vsel %vm523_vm9, %v556_v31, %v1333_v19  ;;  %v560_v34 = vsel %vm523_vm9, %v559_v32, %v1332_v20 }
 0x4de   :  { %v1336_v22 = vpop.permute.xlu1 %1335  ;;  %v563_v42 = vrot.slane %v557_v33, 7  ;;  %v564_v43 = vrot.slane %v560_v34, 7  ;;  %p1459_p11 = por %p1458_p10, %p1457_p9 }
 0x4df   :  { %v1338_v26 = vunpack.i.h.bf16 %v1336_v22  ;;  %v1337_v30 = vunpack.i.l.bf16 %v1336_v22 }
 0x4e0   :  { %p1460_p12 = pnand %p1459_p11, %p1453_p8 }
 0x4e1   :  { %v520_v35 = vsel %vm115_vm3, %v1624_v37, %v1338_v26  ;;  %v525_v36 = vsel %vm115_vm3, %v506_v21, %v1337_v30 }
 0x4e2   :  { %v1346_v39 = vpop.permute.xlu1 %1345  ;;  %v522_v44 = vsel %vm521_vm8, %v520_v35, %v1343_v38  ;;  %v526_v45 = vsel %vm521_vm8, %v525_v36, %v1342_v29 }
 0x4e3   :  { %v1348_v40 = vunpack.i.h.bf16 %v1346_v39  ;;  %v1347_v41 = vunpack.i.l.bf16 %v1346_v39 }
 0x4e5   :  { %v524_v46 = vsel %vm523_vm9, %v522_v44, %v1348_v40  ;;  %v527_v47 = vsel %vm523_vm9, %v526_v45, %v1347_v41 }
 0x4e6   :  { %v569_v48 = vsel %vm567_vm10, %v527_v47, %v564_v43  ;;  %v568_v37 = vsel %vm567_vm10, %v524_v46, %v563_v42 }
 0x4e7   :  { %v571_v49 = vpack.c.bf16 %v569_v48, %v569_v48  ;;  %v570_v50 = vpack.c.bf16 %v568_v37, %v568_v37 }
 0x4e9   :  { %808 = vmatprep.mubr.bf16.mxu0 %v571_v49 }
 0x4ea   :  { %809 = vmatmul.mubr.bf16.vlgmr.msra.gmra.mrb[12].mxu0 %v570_v50 }
 0x5bd   :  { %v810_v59 = vpop.f32.mrb[12].mxu0 }
 0x5be   :  { %v811_v60 = vadd.f32 %v810_v59, %v609_v57  ;;  %v812_v61 = vpop.f32.mrb[13].mxu0 }
 0x5bf   :  { %v813_v62 = vadd.f32 %v812_v61, %v613_v58  ;;  %v814_v63 = vpop.f32.mrb[14].mxu0 }
 0x5c0   :  { %v817_v1 = vmax.f32 %v811_v60, 0.0  ;;  %v815_v2 = vpop.f32.mrb[15].mxu0 }
 0x5c1   :  { %v818_v3 = vmax.f32 %v813_v62, 0.0 }
 0x5c2   :  { %v819_v6 = vpack.c.bf16 %v817_v1, %v817_v1 }
 0x5c3   :  { %v820_v4 = vpack.c.bf16 %v818_v3, %v818_v3 }
 0x5c5   :  { %988 = vmatprep.mubr.bf16.mxu1 %v820_v4 }
 0x5c6   :  { %989 = vmatmul.mubr.bf16.vlgmr.msra.gmra.mrb[8].mxu1 %v819_v6 }
 0x5c7   :  { %1281 = vmatpush3.bf16.msra.mxu1 %v1414_v5  ;;  %1296 = vmatprep.mubr.msk.bf16.mxu1 %vm1482_vm0, %v1481_v0 }
 0x5c8   :  { %1282 = vmatprep.subr.bf16.mxu1 %v1481_v0 }
 0x5cb   :  { %1283 = vmatpush3.bf16.msra.mxu1 %v1415_v27 }
 0x5cc   :  { %1284 = vmatprep.subr.bf16.mxu1 %v1481_v0 }
 0x5cf   :  { %1285 = vmatpush3.bf16.msra.mxu1 %v1416_v28 }
 0x5d0   :  { %1286 = vmatprep.subr.bf16.mxu1 %v1481_v0 }
 0x5d3   :  { %1287 = vmatpush3.bf16.msra.mxu1 %v1417_v7 }
 0x5d4   :  { %1288 = vmatprep.subr.bf16.mxu1 %v1481_v0 }
 0x5d7   :  { %1289 = vmatpush3.bf16.msra.mxu1 %v1418_v8 }
 0x5d8   :  { %1290 = vmatprep.subr.bf16.mxu1 %v1481_v0 }
 0x5db   :  { %1291 = vmatpush3.bf16.msra.mxu1 %v1419_v9 }
 0x5dc   :  { %1292 = vmatprep.subr.bf16.mxu1 %v1481_v0 }
 0x5df   :  { %1293 = vmatpush3.bf16.msra.mxu1 %v1420_v10 }
 0x5e0   :  { %1294 = vmatprep.subr.bf16.mxu1 %v1481_v0  ;;  %v1185_v0 = vld [vmem:[%s1769_s10] ss:$0 sm:$0xff] }
 0x5e3   :  { %1295 = vmatpush3.bf16.msra.mxu1 %v1421_v11 }
 0x699   :  { %v1226_v12 = vpop.f32.mrb[8].mxu1 }
 0x69a   :  { %v1227_v14 = vpop.f32.mrb[9].mxu1 }
 0x69b   :  { %v1228_v15 = vadd.f32 %v1227_v14, %v1226_v12  ;;  %v1229_v16 = vpop.f32.mrb[10].mxu1 }
 0x69c   :  { %v1230_v17 = vpop.f32.mrb[11].mxu1 }
 0x69d   :  { %v991_v18 = vadd.f32 %v1228_v15, %v1168_v13 }
 0x69f   :  { %v996_v19 = vmax.f32 %v991_v18, 0.0 }
 0x6a1   :  { %v997_v20 = vpack.c.bf16 %v996_v19, %v996_v19 }
 0x6a3   :  { %1297 = vmatmul.mubr.bf16.vlgmr.msra.gmra.mrb[12].mxu1 %v997_v20 }
 0x776   :  { %v1103_v21 = vpop.f32.mrb[12].mxu1 }
 0x777   :  { %v1104_v22 = vadd.f32 %v1185_v0, %v1103_v21  ;;  %v1298_v23 = vpop.f32.mrb[13].mxu1 }
 0x778   :  { %v1106_v24 = vpop.f32.mrb[14].mxu1 }
 0x779   :  { %v1299_v25 = vpop.f32.mrb[15].mxu1  ;;  %1110 = vst.msk [vmem:[#allocation5] sm:$0x3] %vm1109_vm11, %v1104_v22 }
 0x77a   :  { %1463 = shalt.err (!%p1460_p12)
}
 0x77b   :  { %s1464_s10 = scalar_lea.hbm %s1770_s11, 32 }
 0x77c   :  { %p1465_p13 = scmp.ne.s32.totalorder %s1770_s11, %s1464_s10  ;;  %p1468_p0 = scmp.lt.u32.totalorder %s1464_s10, %s1770_s11 }
 0x77e   :  { %p1470_p1 = pnand %p1468_p0, %p1465_p13 }
 0x780   :  { %1473 = shalt.err (!%p1470_p1)
}
 0x781   :  { %1120 = dma.vmem_to_hbm [thread:$0]  %s1118_s9, 32, %s1770_s11, [#allocation4]  }
 0x782   :  { %1476 = dma.done.wait [#allocation4], 32  }
 0x783   :  { %1477 = vsyncadd [#allocation4], 4294967264 }
 0x784   :  { %1124 = vsyncpa [#allocation3], 1 }
 0x785   :  { %1125 = vsyncpa [#allocation4], 1 }

</bundles_post_ra>
